<compile_context>
chip_gen: v7x
topology: tpu7x:2x2x1
jax: 0.10.0
libtpu: 0.0.40
codegen_flags: <defaults>
</compile_context>

<pallas_src>
import functools

import jax
import jax.numpy as jnp
from jax.experimental import pallas as pl
from jax.experimental.pallas import tpu as pltpu


CIN, CB = 3, 8            # image channels, backbone channels
POOL = 7                  # RoI output size
REP = 128                 # TwoMLPHead representation size
NUM_CLASSES = 2           # background + 1 foreground class
F_ROI = CB * POOL * POOL  # 392 RoI feature width (channel-first flatten)
F_PAD = 512               # lane-friendly padded RoI feature width
HEAD_OUT = 128            # lane-dense packed head output width


# ----------------------------------------------------------------------------
# Fused backbone kernel (one grid step per image):
#   conv1 (K-stacked, im2col'ed in wrapper) -> ReLU
#   conv2 (K-stacked from VMEM-resident conv1 output) -> ReLU
#   objectness 1x1 conv + in-kernel spatial argmax
# ----------------------------------------------------------------------------
def _backbone_kernel(xc_ref, w1_ref, b1_ref, w2_ref, b2_ref, wo_ref, bo_ref,
                     f_ref, idx_ref, fpad_ref, stack_ref, *, H, W):
    HW = H * W
    PW = 2 * W                      # flat offset of pixel (0,0) in fpad scratch

    # ---- conv1: ONE K=9*CIN MXU dot (im2col done in the wrapper) -----------
    x = xc_ref[0]                                           # (9*CIN, HW) bf16
    f1 = jnp.dot(w1_ref[...], x, preferred_element_type=jnp.float32)
    f1 = jnp.maximum(f1 + b1_ref[...], 0.0)

    # ---- stage conv1 output into the row-padded bf16 scratch ---------------
    # Only the 2-row top/bottom halos are zeroed (interior fully overwritten);
    # zeroed every step so each TensorCore's private scratch is valid under a
    # "parallel" grid.
    fpad_ref[:, :PW] = jnp.zeros((CB, PW), jnp.bfloat16)
    fpad_ref[:, PW + HW:] = jnp.zeros((CB, PW), jnp.bfloat16)
    fpad_ref[:, PW:PW + HW] = f1.astype(jnp.bfloat16)

    # ---- conv2: build K-stacked (9*CB, HW) operand, ONE K=72 dot ------------
    lane = jax.lax.broadcasted_iota(jnp.int32, (1, HW), 1)   # reused by argmax
    col = lane % W
    mask_l = col != 0               # kills wrapped reads of the dx == 0 taps
    mask_r = col != W - 1           # kills wrapped reads of the dx == 2 taps
    for dy in range(3):
        for dx in range(3):
            t = dy * 3 + dx
            off = (dy + 1) * W + dx - 1                      # static tap offset
            sl = fpad_ref[:, off:off + HW]                   # (CB, HW) bf16
            if dx == 0:
                sl = jnp.where(mask_l, sl, 0.0)
            elif dx == 2:
                sl = jnp.where(mask_r, sl, 0.0)
            stack_ref[t * CB:(t + 1) * CB, :] = sl
    f2 = jnp.dot(w2_ref[...], stack_ref[...],
                 preferred_element_type=jnp.float32)
    f2 = jnp.maximum(f2 + b2_ref[...], 0.0)
    f2b = f2.astype(jnp.bfloat16)
    f_ref[0] = f2b                                           # lane-dense (CB, HW)

    # ---- RPN-like objectness (1x1 conv) + in-kernel argmax ------------------
    obj = jnp.dot(wo_ref[...], f2b, preferred_element_type=jnp.float32)
    obj = obj + bo_ref[...]                                  # (1, HW) f32
    m = jnp.max(obj, axis=1, keepdims=True)                  # (1, 1)
    idx = jnp.min(jnp.where(obj >= m, lane, HW), axis=1, keepdims=True)
    idx_ref[0] = idx                                         # (1, 1) int32


def fused_backbone(x_cols, w1k, b1, w2k, b2, wo, bo, *, H, W):
    n = x_cols.shape[0]
    hw = H * W
    kernel = functools.partial(_backbone_kernel, H=H, W=W)
    feat, idx = pl.pallas_call(
        kernel,
        grid=(n,),
        out_shape=(
            jax.ShapeDtypeStruct((n, CB, hw), jnp.bfloat16),
            jax.ShapeDtypeStruct((n, 1, 1), jnp.int32),
        ),
        in_specs=[
            pl.BlockSpec((1, 9 * CIN, hw), lambda i: (i, 0, 0)),
            pl.BlockSpec((CB, 9 * CIN), lambda i: (0, 0)),
            pl.BlockSpec((CB, 1), lambda i: (0, 0)),
            pl.BlockSpec((CB, 9 * CB), lambda i: (0, 0)),
            pl.BlockSpec((CB, 1), lambda i: (0, 0)),
            pl.BlockSpec((1, CB), lambda i: (0, 0)),
            pl.BlockSpec((1, 1), lambda i: (0, 0)),
        ],
        out_specs=(
            pl.BlockSpec((1, CB, hw), lambda i: (i, 0, 0)),
            pl.BlockSpec((1, 1, 1), lambda i: (i, 0, 0)),
        ),
        scratch_shapes=[
            pltpu.VMEM((CB, hw + 4 * W), jnp.bfloat16),      # row-padded conv1 out
            pltpu.VMEM((9 * CB, hw), jnp.bfloat16),          # K-stacked conv2 operand
        ],
        compiler_params=pltpu.CompilerParams(
            dimension_semantics=("parallel",)),
    )(x_cols, w1k, b1, w2k, b2, wo, bo)
    return feat, idx.reshape(n)


# ----------------------------------------------------------------------------
# Fused head kernel: TwoMLPHead (fc6 -> fc7) + FastRCNNPredictor
# (cls_score + softmax, bbox_pred).  Whole batch in one call, no grid.
# Output is a single lane-dense (N, 128) slab: [scores | deltas | zeros].
# ----------------------------------------------------------------------------
def _head_kernel(x_ref, w6_ref, b6_ref, w7_ref, b7_ref, wh_ref, bh_ref,
                 out_ref):
    h6 = jnp.dot(x_ref[...], w6_ref[...], preferred_element_type=jnp.float32)
    h6 = jnp.maximum(h6 + b6_ref[...], 0.0)
    h7 = jnp.dot(h6.astype(jnp.bfloat16), w7_ref[...],
                 preferred_element_type=jnp.float32)
    h7 = jnp.maximum(h7 + b7_ref[...], 0.0)
    y = jnp.dot(h7.astype(jnp.bfloat16), wh_ref[...],
                preferred_element_type=jnp.float32) + bh_ref[...]   # (N, 128)
    logits = y[:, :NUM_CLASSES]
    mx = jnp.max(logits, axis=-1, keepdims=True)
    e = jnp.exp(logits - mx)
    probs = e / jnp.sum(e, axis=-1, keepdims=True)          # exact softmax
    out_ref[...] = y                                         # lane-dense store
    out_ref[:, :NUM_CLASSES] = probs                         # small overwrite


def fused_head(roi_pad, w6, b6, w7, b7, wh, bh):
    n = roi_pad.shape[0]
    out = pl.pallas_call(
        _head_kernel,
        out_shape=jax.ShapeDtypeStruct((n, HEAD_OUT), jnp.float32),
    )(roi_pad, w6, b6, w7, b7, wh, bh)
    scores = out[:, :NUM_CLASSES]
    deltas = out[:, NUM_CLASSES:NUM_CLASSES + 4 * NUM_CLASSES]
    return scores, deltas


# ----------------------------------------------------------------------------
# Parameters + forward
# ----------------------------------------------------------------------------
def init_params(key):
    def dense(k, shape, fan_in):
        std = (2.0 / fan_in) ** 0.5
        return std * jax.random.normal(k, shape, jnp.float32)

    ks = jax.random.split(key, 8)
    return {
        "conv1_w": dense(ks[0], (CB, CIN, 3, 3), 9 * CIN),
        "conv1_b": jnp.zeros((CB,), jnp.float32),
        "conv2_w": dense(ks[1], (CB, CB, 3, 3), 9 * CB),
        "conv2_b": jnp.zeros((CB,), jnp.float32),
        "obj_w":   dense(ks[2], (1, CB), CB),
        "obj_b":   jnp.zeros((1,), jnp.float32),
        "fc6_w":   dense(ks[3], (F_ROI, REP), F_ROI),
        "fc6_b":   jnp.zeros((REP,), jnp.float32),
        "fc7_w":   dense(ks[4], (REP, REP), REP),
        "fc7_b":   jnp.zeros((REP,), jnp.float32),
        "cls_w":   0.01 * jax.random.normal(ks[5], (REP, NUM_CLASSES), jnp.float32),
        "cls_b":   jnp.zeros((NUM_CLASSES,), jnp.float32),
        "box_w":   0.01 * jax.random.normal(ks[6], (REP, 4 * NUM_CLASSES), jnp.float32),
        "box_b":   jnp.zeros((4 * NUM_CLASSES,), jnp.float32),
    }


@jax.jit
def rcnn_forward(params, images_nchw):
    """images_nchw: [N, 3, H, W] float32.  Returns dict of boxes/labels/scores
    with exactly one detection per image (box_detections_per_img=1)."""
    n, cin, h, w = images_nchw.shape
    assert cin == CIN and h >= POOL and w >= POOL
    hw = h * w

    # --- conv1 im2col in the wrapper (27 rows/img; kernel does one K=27 dot),
    #     exact zero 'same' padding, bf16 MXU operands -----------------------
    xp = jnp.pad(images_nchw.astype(jnp.bfloat16),
                 ((0, 0), (0, 0), (1, 1), (1, 1)))
    cols = [xp[:, :, dy:dy + h, dx:dx + w]
            for dy in range(3) for dx in range(3)]
    x_cols = jnp.stack(cols, axis=1).reshape(n, 9 * CIN, hw)

    w1k = params["conv1_w"].transpose(0, 2, 3, 1).reshape(
        CB, 9 * CIN).astype(jnp.bfloat16)
    w2k = params["conv2_w"].transpose(0, 2, 3, 1).reshape(
        CB, 9 * CB).astype(jnp.bfloat16)
    wo = params["obj_w"].astype(jnp.bfloat16)
    b1 = params["conv1_b"].reshape(CB, 1)
    b2 = params["conv2_b"].reshape(CB, 1)
    bo = params["obj_b"].reshape(1, 1)

    # --- fused backbone (stand-in for ResNet-50 FPN) + objectness argmax ----
    feat, idx = fused_backbone(x_cols, w1k, b1, w2k, b2, wo, bo, H=h, W=w)

    # --- single best proposal per image (stand-in for anchor RPN + NMS) -----
    cy, cx = idx // w, idx % w
    tops = jnp.clip(cy - POOL // 2, 0, h - POOL).astype(jnp.int32)
    lefts = jnp.clip(cx - POOL // 2, 0, w - POOL).astype(jnp.int32)

    # --- RoI crop (stand-in for RoIAlign), channel-first flatten like torch --
    feat = feat.reshape(n, CB, h, w)

    def crop(feat_img, t, l):
        return jax.lax.dynamic_slice(feat_img, (0, t, l), (CB, POOL, POOL))

    rois = jax.vmap(crop)(feat, tops, lefts)              # (N, CB, 7, 7) bf16
    roi_flat = rois.reshape(n, F_ROI)
    roi_pad = jnp.pad(roi_flat, ((0, 0), (0, F_PAD - F_ROI)))  # lane-friendly 512

    # --- fused TwoMLPHead + FastRCNNPredictor (one batched matmul chain) ----
    w6 = jnp.pad(params["fc6_w"],
                 ((0, F_PAD - F_ROI), (0, 0))).astype(jnp.bfloat16)
    b6 = params["fc6_b"].reshape(1, REP)
    w7 = params["fc7_w"].astype(jnp.bfloat16)
    b7 = params["fc7_b"].reshape(1, REP)
    wh_raw = jnp.concatenate([params["cls_w"], params["box_w"]], axis=1)
    wh = jnp.pad(wh_raw,
                 ((0, 0), (0, HEAD_OUT - wh_raw.shape[1]))).astype(jnp.bfloat16)
    bh_raw = jnp.concatenate([params["cls_b"], params["box_b"]]).reshape(1, -1)
    bh = jnp.pad(bh_raw, ((0, 0), (0, HEAD_OUT - bh_raw.shape[1])))
    scores_all, deltas = fused_head(roi_pad, w6, b6, w7, b7, wh, bh)

    # --- post-processing: best foreground class, decode + clip its box ------
    fg_scores = scores_all[:, 1:]
    fg_idx = jnp.argmax(fg_scores, axis=-1)
    labels = (fg_idx + 1).astype(jnp.int32)
    scores = jnp.max(fg_scores, axis=-1)
    d = deltas.reshape(n, NUM_CLASSES, 4)[jnp.arange(n), labels]

    px1 = lefts.astype(jnp.float32)
    py1 = tops.astype(jnp.float32)
    pw = jnp.full((n,), float(POOL), jnp.float32)
    ph = jnp.full((n,), float(POOL), jnp.float32)
    pcx = px1 + 0.5 * pw
    pcy = py1 + 0.5 * ph
    ncx = d[:, 0] * pw + pcx
    ncy = d[:, 1] * ph + pcy
    nw = jnp.exp(d[:, 2]) * pw
    nh = jnp.exp(d[:, 3]) * ph
    x1 = jnp.clip(ncx - 0.5 * nw, 0.0, float(w))   # x clipped to image width
    y1 = jnp.clip(ncy - 0.5 * nh, 0.0, float(h))   # y clipped to image height
    x2 = jnp.clip(ncx + 0.5 * nw, 0.0, float(w))
    y2 = jnp.clip(ncy + 0.5 * nh, 0.0, float(h))
    boxes = jnp.stack([x1, y1, x2, y2], axis=-1)

    return {
        "boxes": boxes.reshape(n, 1, 4),
        "labels": labels.reshape(n, 1),
        "scores": scores.reshape(n, 1),
    }


if __name__ == "__main__":
    key = jax.random.PRNGKey(0)
    pkey, ikey = jax.random.split(key)
    params = init_params(pkey)

    # small example batch: 2 RGB images of 32x32 (NCHW, like torch)
    images = jax.random.uniform(ikey, (2, 3, 32, 32), jnp.float32)

    pred = rcnn_forward(params, images)
    jax.block_until_ready(pred)

    assert pred["boxes"].shape == (2, 1, 4)
    assert pred["labels"].shape == (2, 1)
    assert pred["scores"].shape == (2, 1)
    print("KERNEL_OK")
</pallas_src>

<mosaic_0001>
module attributes {stable_mosaic.version = 11 : i64} {
  func.func @_backbone_kernel(%arg0: i32, %arg1: memref<1x27x1024xbf16, #tpu.memory_space<vmem>>, %arg2: memref<8x27xbf16, #tpu.memory_space<vmem>>, %arg3: memref<8x1xf32, #tpu.memory_space<vmem>>, %arg4: memref<8x72xbf16, #tpu.memory_space<vmem>>, %arg5: memref<8x1xf32, #tpu.memory_space<vmem>>, %arg6: memref<1x8xbf16, #tpu.memory_space<vmem>>, %arg7: memref<1x1xf32, #tpu.memory_space<vmem>>, %arg8: memref<1x8x1024xbf16, #tpu.memory_space<vmem>>, %arg9: memref<1x1x1xi32, #tpu.memory_space<vmem>>, %arg10: memref<8x1152xbf16, #tpu.memory_space<vmem>>, %arg11: memref<72x1024xbf16, #tpu.memory_space<vmem>>) attributes {dimension_semantics = [#tpu.dimension_semantics<parallel>], iteration_bounds = array<i64: 2>, scalar_prefetch = 0 : i64, scratch_operands = 2 : i64, tpu.core_type = #tpu.core_type<tc>, window_params = [{transform_indices = @transform_0, window_bounds = array<i64: 1, 27, 1024>}, {pipeline_mode = #tpu.pipeline_mode<synchronous>, transform_indices = @transform_1, window_bounds = array<i64: 8, 27>}, {pipeline_mode = #tpu.pipeline_mode<synchronous>, transform_indices = @transform_2, window_bounds = array<i64: 8, 1>}, {pipeline_mode = #tpu.pipeline_mode<synchronous>, transform_indices = @transform_3, window_bounds = array<i64: 8, 72>}, {pipeline_mode = #tpu.pipeline_mode<synchronous>, transform_indices = @transform_4, window_bounds = array<i64: 8, 1>}, {pipeline_mode = #tpu.pipeline_mode<synchronous>, transform_indices = @transform_5, window_bounds = array<i64: 1, 8>}, {pipeline_mode = #tpu.pipeline_mode<synchronous>, transform_indices = @transform_6, window_bounds = array<i64: 1, 1>}, {transform_indices = @transform_7, window_bounds = array<i64: 1, 8, 1024>}, {transform_indices = @transform_8, window_bounds = array<i64: 1, 1, 1>}]} {
    %c0 = arith.constant 0 : index
    %c0_0 = arith.constant 0 : index
    %c0_1 = arith.constant 0 : index
    %0 = vector.load %arg1[%c0, %c0_0, %c0_1] : memref<1x27x1024xbf16, #tpu.memory_space<vmem>>, vector<1x27x1024xbf16>
    %1 = vector.shape_cast %0 : vector<1x27x1024xbf16> to vector<27x1024xbf16>
    %c0_2 = arith.constant 0 : index
    %c0_3 = arith.constant 0 : index
    %2 = vector.load %arg2[%c0_2, %c0_3] : memref<8x27xbf16, #tpu.memory_space<vmem>>, vector<8x27xbf16>
    %cst = arith.constant dense<0.000000e+00> : vector<8x1024xf32>
    %3 = tpu.matmul %2, %1, %cst {dimension_numbers = #tpu.dot_dimension_numbers<[1], [0], [0], [1], [0, 0, 1, 1], [], []>} : vector<8x27xbf16>, vector<27x1024xbf16>, vector<8x1024xf32> -> vector<8x1024xf32>
    %c0_4 = arith.constant 0 : index
    %c0_5 = arith.constant 0 : index
    %4 = vector.load %arg3[%c0_4, %c0_5] : memref<8x1xf32, #tpu.memory_space<vmem>>, vector<8x1xf32>
    %5 = vector.broadcast %4 : vector<8x1xf32> to vector<8x1024xf32>
    %6 = arith.addf %3, %5 : vector<8x1024xf32>
    %cst_6 = arith.constant 0.000000e+00 : f32
    %7 = vector.broadcast %cst_6 : f32 to vector<8x1024xf32>
    %8 = arith.maximumf %6, %7 : vector<8x1024xf32>
    %cst_7 = arith.constant 0.000000e+00 : bf16
    %9 = vector.broadcast %cst_7 : bf16 to vector<8x64xbf16>
    %c0_8 = arith.constant 0 : index
    %c0_9 = arith.constant 0 : index
    %10 = vector.load %arg10[%c0_8, %c0_9] : memref<8x1152xbf16, #tpu.memory_space<vmem>>, vector<8x64xbf16>
    tpu.vector_store %arg10[%c0_8, %c0_9], %9 {strides = array<i32>} : memref<8x1152xbf16, #tpu.memory_space<vmem>>, vector<8x64xbf16>,
    %cst_10 = arith.constant 0.000000e+00 : bf16
    %11 = vector.broadcast %cst_10 : bf16 to vector<8x64xbf16>
    %c0_11 = arith.constant 0 : index
    %c1088 = arith.constant 1088 : index
    %12 = vector.load %arg10[%c0_11, %c1088] : memref<8x1152xbf16, #tpu.memory_space<vmem>>, vector<8x64xbf16>
    tpu.vector_store %arg10[%c0_11, %c1088], %11 {strides = array<i32>} : memref<8x1152xbf16, #tpu.memory_space<vmem>>, vector<8x64xbf16>,
    %13 = arith.truncf %8 : vector<8x1024xf32> to vector<8x1024xbf16>
    %c0_12 = arith.constant 0 : index
    %c64 = arith.constant 64 : index
    %14 = vector.load %arg10[%c0_12, %c64] : memref<8x1152xbf16, #tpu.memory_space<vmem>>, vector<8x1024xbf16>
    tpu.vector_store %arg10[%c0_12, %c64], %13 {strides = array<i32>} : memref<8x1152xbf16, #tpu.memory_space<vmem>>, vector<8x1024xbf16>,
    %15 = tpu.iota {dimensions = array<i32: 1>} : vector<1x1024xi32>
    %c32_i32 = arith.constant 32 : i32
    %c0_i32 = arith.constant 0 : i32
    %16 = arith.cmpi eq, %c32_i32, %c0_i32 : i32
    %c1_i32 = arith.constant 1 : i32
    %17 = arith.select %16, %c1_i32, %c32_i32 : i32
    %18 = vector.broadcast %17 : i32 to vector<1x1024xi32>
    %19 = arith.remsi %15, %18 : vector<1x1024xi32>
    %c0_i32_13 = arith.constant 0 : i32
    %20 = vector.broadcast %c0_i32_13 : i32 to vector<1x1024xi32>
    %21 = arith.cmpi ne, %19, %20 : vector<1x1024xi32>
    %c0_i32_14 = arith.constant 0 : i32
    %22 = vector.broadcast %c0_i32_14 : i32 to vector<1x1024xi32>
    %23 = arith.cmpi slt, %19, %22 : vector<1x1024xi32>
    %c0_i32_15 = arith.constant 0 : i32
    %24 = arith.cmpi slt, %17, %c0_i32_15 : i32
    %25 = vector.broadcast %24 : i1 to vector<1x1024xi1>
    %26 = vector.broadcast %25 : vector<1x1024xi1> to vector<1x1024xi1>
    %27 = arith.xori %23, %26 : vector<1x1024xi1>
    %28 = arith.andi %27, %21 : vector<1x1024xi1>
    %29 = vector.broadcast %17 : i32 to vector<1x1024xi32>
    %30 = arith.addi %19, %29 : vector<1x1024xi32>
    %31 = arith.select %28, %30, %19 : vector<1x1024xi1>, vector<1x1024xi32>
    %c0_i32_16 = arith.constant 0 : i32
    %32 = vector.broadcast %c0_i32_16 : i32 to vector<1x1024xi32>
    %33 = arith.cmpi ne, %31, %32 : vector<1x1024xi32>
    %c31_i32 = arith.constant 31 : i32
    %34 = vector.broadcast %c31_i32 : i32 to vector<1x1024xi32>
    %35 = arith.cmpi ne, %31, %34 : vector<1x1024xi32>
    %c0_17 = arith.constant 0 : index
    %c31 = arith.constant 31 : index
    %36 = vector.load %arg10[%c0_17, %c31] : memref<8x1152xbf16, #tpu.memory_space<vmem>>, vector<8x1024xbf16>
    %cst_18 = arith.constant 0.000000e+00 : f32
    %37 = arith.truncf %cst_18 : f32 to bf16
    %38 = vector.shape_cast %33 : vector<1x1024xi1> to vector<1x1024xi1>
    %39 = vector.broadcast %38 : vector<1x1024xi1> to vector<8x1024xi1>
    %40 = vector.broadcast %37 : bf16 to vector<8x1024xbf16>
    %41 = arith.select %39, %36, %40 : vector<8x1024xi1>, vector<8x1024xbf16>
    %c0_19 = arith.constant 0 : index
    %c0_20 = arith.constant 0 : index
    %42 = vector.load %arg11[%c0_19, %c0_20] : memref<72x1024xbf16, #tpu.memory_space<vmem>>, vector<8x1024xbf16>
    tpu.vector_store %arg11[%c0_19, %c0_20], %41 {strides = array<i32>} : memref<72x1024xbf16, #tpu.memory_space<vmem>>, vector<8x1024xbf16>,
    %c0_21 = arith.constant 0 : index
    %c32 = arith.constant 32 : index
    %43 = vector.load %arg10[%c0_21, %c32] : memref<8x1152xbf16, #tpu.memory_space<vmem>>, vector<8x1024xbf16>
    %c8 = arith.constant 8 : index
    %c0_22 = arith.constant 0 : index
    %44 = vector.load %arg11[%c8, %c0_22] : memref<72x1024xbf16, #tpu.memory_space<vmem>>, vector<8x1024xbf16>
    tpu.vector_store %arg11[%c8, %c0_22], %43 {strides = array<i32>} : memref<72x1024xbf16, #tpu.memory_space<vmem>>, vector<8x1024xbf16>,
    %c0_23 = arith.constant 0 : index
    %c33 = arith.constant 33 : index
    %45 = vector.load %arg10[%c0_23, %c33] : memref<8x1152xbf16, #tpu.memory_space<vmem>>, vector<8x1024xbf16>
    %cst_24 = arith.constant 0.000000e+00 : f32
    %46 = arith.truncf %cst_24 : f32 to bf16
    %47 = vector.shape_cast %35 : vector<1x1024xi1> to vector<1x1024xi1>
    %48 = vector.broadcast %47 : vector<1x1024xi1> to vector<8x1024xi1>
    %49 = vector.broadcast %46 : bf16 to vector<8x1024xbf16>
    %50 = arith.select %48, %45, %49 : vector<8x1024xi1>, vector<8x1024xbf16>
    %c16 = arith.constant 16 : index
    %c0_25 = arith.constant 0 : index
    %51 = vector.load %arg11[%c16, %c0_25] : memref<72x1024xbf16, #tpu.memory_space<vmem>>, vector<8x1024xbf16>
    tpu.vector_store %arg11[%c16, %c0_25], %50 {strides = array<i32>} : memref<72x1024xbf16, #tpu.memory_space<vmem>>, vector<8x1024xbf16>,
    %c0_26 = arith.constant 0 : index
    %c63 = arith.constant 63 : index
    %52 = vector.load %arg10[%c0_26, %c63] : memref<8x1152xbf16, #tpu.memory_space<vmem>>, vector<8x1024xbf16>
    %cst_27 = arith.constant 0.000000e+00 : f32
    %53 = arith.truncf %cst_27 : f32 to bf16
    %54 = vector.shape_cast %33 : vector<1x1024xi1> to vector<1x1024xi1>
    %55 = vector.broadcast %54 : vector<1x1024xi1> to vector<8x1024xi1>
    %56 = vector.broadcast %53 : bf16 to vector<8x1024xbf16>
    %57 = arith.select %55, %52, %56 : vector<8x1024xi1>, vector<8x1024xbf16>
    %c24 = arith.constant 24 : index
    %c0_28 = arith.constant 0 : index
    %58 = vector.load %arg11[%c24, %c0_28] : memref<72x1024xbf16, #tpu.memory_space<vmem>>, vector<8x1024xbf16>
    tpu.vector_store %arg11[%c24, %c0_28], %57 {strides = array<i32>} : memref<72x1024xbf16, #tpu.memory_space<vmem>>, vector<8x1024xbf16>,
    %c0_29 = arith.constant 0 : index
    %c64_30 = arith.constant 64 : index
    %59 = vector.load %arg10[%c0_29, %c64_30] : memref<8x1152xbf16, #tpu.memory_space<vmem>>, vector<8x1024xbf16>
    %c32_31 = arith.constant 32 : index
    %c0_32 = arith.constant 0 : index
    %60 = vector.load %arg11[%c32_31, %c0_32] : memref<72x1024xbf16, #tpu.memory_space<vmem>>, vector<8x1024xbf16>
    tpu.vector_store %arg11[%c32_31, %c0_32], %59 {strides = array<i32>} : memref<72x1024xbf16, #tpu.memory_space<vmem>>, vector<8x1024xbf16>,
    %c0_33 = arith.constant 0 : index
    %c65 = arith.constant 65 : index
    %61 = vector.load %arg10[%c0_33, %c65] : memref<8x1152xbf16, #tpu.memory_space<vmem>>, vector<8x1024xbf16>
    %cst_34 = arith.constant 0.000000e+00 : f32
    %62 = arith.truncf %cst_34 : f32 to bf16
    %63 = vector.shape_cast %35 : vector<1x1024xi1> to vector<1x1024xi1>
    %64 = vector.broadcast %63 : vector<1x1024xi1> to vector<8x1024xi1>
    %65 = vector.broadcast %62 : bf16 to vector<8x1024xbf16>
    %66 = arith.select %64, %61, %65 : vector<8x1024xi1>, vector<8x1024xbf16>
    %c40 = arith.constant 40 : index
    %c0_35 = arith.constant 0 : index
    %67 = vector.load %arg11[%c40, %c0_35] : memref<72x1024xbf16, #tpu.memory_space<vmem>>, vector<8x1024xbf16>
    tpu.vector_store %arg11[%c40, %c0_35], %66 {strides = array<i32>} : memref<72x1024xbf16, #tpu.memory_space<vmem>>, vector<8x1024xbf16>,
    %c0_36 = arith.constant 0 : index
    %c95 = arith.constant 95 : index
    %68 = vector.load %arg10[%c0_36, %c95] : memref<8x1152xbf16, #tpu.memory_space<vmem>>, vector<8x1024xbf16>
    %cst_37 = arith.constant 0.000000e+00 : f32
    %69 = arith.truncf %cst_37 : f32 to bf16
    %70 = vector.shape_cast %33 : vector<1x1024xi1> to vector<1x1024xi1>
    %71 = vector.broadcast %70 : vector<1x1024xi1> to vector<8x1024xi1>
    %72 = vector.broadcast %69 : bf16 to vector<8x1024xbf16>
    %73 = arith.select %71, %68, %72 : vector<8x1024xi1>, vector<8x1024xbf16>
    %c48 = arith.constant 48 : index
    %c0_38 = arith.constant 0 : index
    %74 = vector.load %arg11[%c48, %c0_38] : memref<72x1024xbf16, #tpu.memory_space<vmem>>, vector<8x1024xbf16>
    tpu.vector_store %arg11[%c48, %c0_38], %73 {strides = array<i32>} : memref<72x1024xbf16, #tpu.memory_space<vmem>>, vector<8x1024xbf16>,
    %c0_39 = arith.constant 0 : index
    %c96 = arith.constant 96 : index
    %75 = vector.load %arg10[%c0_39, %c96] : memref<8x1152xbf16, #tpu.memory_space<vmem>>, vector<8x1024xbf16>
    %c56 = arith.constant 56 : index
    %c0_40 = arith.constant 0 : index
    %76 = vector.load %arg11[%c56, %c0_40] : memref<72x1024xbf16, #tpu.memory_space<vmem>>, vector<8x1024xbf16>
    tpu.vector_store %arg11[%c56, %c0_40], %75 {strides = array<i32>} : memref<72x1024xbf16, #tpu.memory_space<vmem>>, vector<8x1024xbf16>,
    %c0_41 = arith.constant 0 : index
    %c97 = arith.constant 97 : index
    %77 = vector.load %arg10[%c0_41, %c97] : memref<8x1152xbf16, #tpu.memory_space<vmem>>, vector<8x1024xbf16>
    %cst_42 = arith.constant 0.000000e+00 : f32
    %78 = arith.truncf %cst_42 : f32 to bf16
    %79 = vector.shape_cast %35 : vector<1x1024xi1> to vector<1x1024xi1>
    %80 = vector.broadcast %79 : vector<1x1024xi1> to vector<8x1024xi1>
    %81 = vector.broadcast %78 : bf16 to vector<8x1024xbf16>
    %82 = arith.select %80, %77, %81 : vector<8x1024xi1>, vector<8x1024xbf16>
    %c64_43 = arith.constant 64 : index
    %c0_44 = arith.constant 0 : index
    %83 = vector.load %arg11[%c64_43, %c0_44] : memref<72x1024xbf16, #tpu.memory_space<vmem>>, vector<8x1024xbf16>
    tpu.vector_store %arg11[%c64_43, %c0_44], %82 {strides = array<i32>} : memref<72x1024xbf16, #tpu.memory_space<vmem>>, vector<8x1024xbf16>,
    %c0_45 = arith.constant 0 : index
    %c0_46 = arith.constant 0 : index
    %84 = vector.load %arg4[%c0_45, %c0_46] : memref<8x72xbf16, #tpu.memory_space<vmem>>, vector<8x72xbf16>
    %c0_47 = arith.constant 0 : index
    %c0_48 = arith.constant 0 : index
    %85 = vector.load %arg11[%c0_47, %c0_48] : memref<72x1024xbf16, #tpu.memory_space<vmem>>, vector<72x1024xbf16>
    %cst_49 = arith.constant dense<0.000000e+00> : vector<8x1024xf32>
    %86 = tpu.matmul %84, %85, %cst_49 {dimension_numbers = #tpu.dot_dimension_numbers<[1], [0], [0], [1], [0, 0, 1, 1], [], []>} : vector<8x72xbf16>, vector<72x1024xbf16>, vector<8x1024xf32> -> vector<8x1024xf32>
    %c0_50 = arith.constant 0 : index
    %c0_51 = arith.constant 0 : index
    %87 = vector.load %arg5[%c0_50, %c0_51] : memref<8x1xf32, #tpu.memory_space<vmem>>, vector<8x1xf32>
    %88 = vector.broadcast %87 : vector<8x1xf32> to vector<8x1024xf32>
    %89 = arith.addf %86, %88 : vector<8x1024xf32>
    %cst_52 = arith.constant 0.000000e+00 : f32
    %90 = vector.broadcast %cst_52 : f32 to vector<8x1024xf32>
    %91 = arith.maximumf %89, %90 : vector<8x1024xf32>
    %92 = arith.truncf %91 : vector<8x1024xf32> to vector<8x1024xbf16>
    %c0_53 = arith.constant 0 : index
    %c0_54 = arith.constant 0 : index
    %c0_55 = arith.constant 0 : index
    %93 = vector.load %arg8[%c0_53, %c0_54, %c0_55] : memref<1x8x1024xbf16, #tpu.memory_space<vmem>>, vector<1x8x1024xbf16>
    %94 = vector.shape_cast %93 : vector<1x8x1024xbf16> to vector<8x1024xbf16>
    %95 = vector.shape_cast %92 : vector<8x1024xbf16> to vector<1x8x1024xbf16>
    tpu.vector_store %arg8[%c0_53, %c0_54, %c0_55], %95 {strides = array<i32>} : memref<1x8x1024xbf16, #tpu.memory_space<vmem>>, vector<1x8x1024xbf16>,
    %c0_56 = arith.constant 0 : index
    %c0_57 = arith.constant 0 : index
    %96 = vector.load %arg6[%c0_56, %c0_57] : memref<1x8xbf16, #tpu.memory_space<vmem>>, vector<1x8xbf16>
    %cst_58 = arith.constant dense<0.000000e+00> : vector<1x1024xf32>
    %97 = tpu.matmul %96, %92, %cst_58 {dimension_numbers = #tpu.dot_dimension_numbers<[1], [0], [0], [1], [0, 0, 1, 1], [], []>} : vector<1x8xbf16>, vector<8x1024xbf16>, vector<1x1024xf32> -> vector<1x1024xf32>
    %c0_59 = arith.constant 0 : index
    %c0_60 = arith.constant 0 : index
    %98 = vector.load %arg7[%c0_59, %c0_60] : memref<1x1xf32, #tpu.memory_space<vmem>>, vector<1x1xf32>
    %99 = vector.broadcast %98 : vector<1x1xf32> to vector<1x1024xf32>
    %100 = arith.addf %97, %99 : vector<1x1024xf32>
    %cst_61 = arith.constant dense<0xFF800000> : vector<1xf32>
    %101 = vector.multi_reduction <maximumf>, %100, %cst_61 [1] : vector<1x1024xf32> to vector<1xf32>
    %102 = vector.shape_cast %101 : vector<1xf32> to vector<1x1xf32>
    %103 = vector.broadcast %102 : vector<1x1xf32> to vector<1x1024xf32>
    %104 = arith.cmpf oge, %100, %103 : vector<1x1024xf32>
    %c1024_i32 = arith.constant 1024 : i32
    %105 = vector.broadcast %c1024_i32 : i32 to vector<1x1024xi32>
    %106 = arith.select %104, %15, %105 : vector<1x1024xi1>, vector<1x1024xi32>
    %cst_62 = arith.constant dense<2147483647> : vector<1xi32>
    %107 = vector.multi_reduction <minsi>, %106, %cst_62 [1] : vector<1x1024xi32> to vector<1xi32>
    %108 = vector.shape_cast %107 : vector<1xi32> to vector<1x1xi32>
    %c0_63 = arith.constant 0 : index
    %c0_64 = arith.constant 0 : index
    %c0_65 = arith.constant 0 : index
    %109 = vector.load %arg9[%c0_63, %c0_64, %c0_65] : memref<1x1x1xi32, #tpu.memory_space<vmem>>, vector<1x1x1xi32>
    %110 = vector.shape_cast %109 : vector<1x1x1xi32> to vector<1x1xi32>
    %111 = vector.shape_cast %108 : vector<1x1xi32> to vector<1x1x1xi32>
    tpu.vector_store %arg9[%c0_63, %c0_64, %c0_65], %111 {strides = array<i32>} : memref<1x1x1xi32, #tpu.memory_space<vmem>>, vector<1x1x1xi32>,
    return
  }
  func.func @transform_0(%arg0: i32) -> (i32, i32, i32) {
    %c0_i32 = arith.constant 0 : i32
    %c0_i32_0 = arith.constant 0 : i32
    %c0_i32_1 = arith.constant 0 : i32
    return %arg0, %c0_i32, %c0_i32_0 : i32, i32, i32
  }
  func.func @transform_1(%arg0: i32) -> (i32, i32) {
    %c0_i32 = arith.constant 0 : i32
    %c0_i32_0 = arith.constant 0 : i32
    %c0_i32_1 = arith.constant 0 : i32
    return %c0_i32, %c0_i32_0 : i32, i32
  }
  func.func @transform_2(%arg0: i32) -> (i32, i32) {
    %c0_i32 = arith.constant 0 : i32
    %c0_i32_0 = arith.constant 0 : i32
    %c0_i32_1 = arith.constant 0 : i32
    return %c0_i32, %c0_i32_0 : i32, i32
  }
  func.func @transform_3(%arg0: i32) -> (i32, i32) {
    %c0_i32 = arith.constant 0 : i32
    %c0_i32_0 = arith.constant 0 : i32
    %c0_i32_1 = arith.constant 0 : i32
    return %c0_i32, %c0_i32_0 : i32, i32
  }
  func.func @transform_4(%arg0: i32) -> (i32, i32) {
    %c0_i32 = arith.constant 0 : i32
    %c0_i32_0 = arith.constant 0 : i32
    %c0_i32_1 = arith.constant 0 : i32
    return %c0_i32, %c0_i32_0 : i32, i32
  }
  func.func @transform_5(%arg0: i32) -> (i32, i32) {
    %c0_i32 = arith.constant 0 : i32
    %c0_i32_0 = arith.constant 0 : i32
    %c0_i32_1 = arith.constant 0 : i32
    return %c0_i32, %c0_i32_0 : i32, i32
  }
  func.func @transform_6(%arg0: i32) -> (i32, i32) {
    %c0_i32 = arith.constant 0 : i32
    %c0_i32_0 = arith.constant 0 : i32
    %c0_i32_1 = arith.constant 0 : i32
    return %c0_i32, %c0_i32_0 : i32, i32
  }
  func.func @transform_7(%arg0: i32) -> (i32, i32, i32) {
    %c0_i32 = arith.constant 0 : i32
    %c0_i32_0 = arith.constant 0 : i32
    %c0_i32_1 = arith.constant 0 : i32
    return %arg0, %c0_i32, %c0_i32_0 : i32, i32, i32
  }
  func.func @transform_8(%arg0: i32) -> (i32, i32, i32) {
    %c0_i32 = arith.constant 0 : i32
    %c0_i32_0 = arith.constant 0 : i32
    %c0_i32_1 = arith.constant 0 : i32
    return %arg0, %c0_i32, %c0_i32_0 : i32, i32, i32
  }
}

module attributes {stable_mosaic.version = 11 : i64} {
  func.func @_head_kernel(%arg0: memref<2x512xbf16, #tpu.memory_space<vmem>>, %arg1: memref<512x128xbf16, #tpu.memory_space<vmem>>, %arg2: memref<1x128xf32, #tpu.memory_space<vmem>>, %arg3: memref<128x128xbf16, #tpu.memory_space<vmem>>, %arg4: memref<1x128xf32, #tpu.memory_space<vmem>>, %arg5: memref<128x128xbf16, #tpu.memory_space<vmem>>, %arg6: memref<1x128xf32, #tpu.memory_space<vmem>>, %arg7: memref<2x128xf32, #tpu.memory_space<vmem>>) attributes {dimension_semantics = [], scalar_prefetch = 0 : i64, scratch_operands = 0 : i64, tpu.core_type = #tpu.core_type<tc>} {
    %c0 = arith.constant 0 : index
    %c0_0 = arith.constant 0 : index
    %0 = vector.load %arg0[%c0, %c0_0] : memref<2x512xbf16, #tpu.memory_space<vmem>>, vector<2x512xbf16>
    %c0_1 = arith.constant 0 : index
    %c0_2 = arith.constant 0 : index
    %1 = vector.load %arg1[%c0_1, %c0_2] : memref<512x128xbf16, #tpu.memory_space<vmem>>, vector<512x128xbf16>
    %cst = arith.constant dense<0.000000e+00> : vector<2x128xf32>
    %2 = tpu.matmul %0, %1, %cst {dimension_numbers = #tpu.dot_dimension_numbers<[1], [0], [0], [1], [0, 0, 1, 1], [], []>} : vector<2x512xbf16>, vector<512x128xbf16>, vector<2x128xf32> -> vector<2x128xf32>
    %c0_3 = arith.constant 0 : index
    %c0_4 = arith.constant 0 : index
    %3 = vector.load %arg2[%c0_3, %c0_4] : memref<1x128xf32, #tpu.memory_space<vmem>>, vector<1x128xf32>
    %4 = vector.broadcast %3 : vector<1x128xf32> to vector<2x128xf32>
    %5 = arith.addf %2, %4 : vector<2x128xf32>
    %cst_5 = arith.constant 0.000000e+00 : f32
    %6 = vector.broadcast %cst_5 : f32 to vector<2x128xf32>
    %7 = arith.maximumf %5, %6 : vector<2x128xf32>
    %8 = arith.truncf %7 : vector<2x128xf32> to vector<2x128xbf16>
    %c0_6 = arith.constant 0 : index
    %c0_7 = arith.constant 0 : index
    %9 = vector.load %arg3[%c0_6, %c0_7] : memref<128x128xbf16, #tpu.memory_space<vmem>>, vector<128x128xbf16>
    %cst_8 = arith.constant dense<0.000000e+00> : vector<2x128xf32>
    %10 = tpu.matmul %8, %9, %cst_8 {dimension_numbers = #tpu.dot_dimension_numbers<[1], [0], [0], [1], [0, 0, 1, 1], [], []>} : vector<2x128xbf16>, vector<128x128xbf16>, vector<2x128xf32> -> vector<2x128xf32>
    %c0_9 = arith.constant 0 : index
    %c0_10 = arith.constant 0 : index
    %11 = vector.load %arg4[%c0_9, %c0_10] : memref<1x128xf32, #tpu.memory_space<vmem>>, vector<1x128xf32>
    %12 = vector.broadcast %11 : vector<1x128xf32> to vector<2x128xf32>
    %13 = arith.addf %10, %12 : vector<2x128xf32>
    %cst_11 = arith.constant 0.000000e+00 : f32
    %14 = vector.broadcast %cst_11 : f32 to vector<2x128xf32>
    %15 = arith.maximumf %13, %14 : vector<2x128xf32>
    %16 = arith.truncf %15 : vector<2x128xf32> to vector<2x128xbf16>
    %c0_12 = arith.constant 0 : index
    %c0_13 = arith.constant 0 : index
    %17 = vector.load %arg5[%c0_12, %c0_13] : memref<128x128xbf16, #tpu.memory_space<vmem>>, vector<128x128xbf16>
    %cst_14 = arith.constant dense<0.000000e+00> : vector<2x128xf32>
    %18 = tpu.matmul %16, %17, %cst_14 {dimension_numbers = #tpu.dot_dimension_numbers<[1], [0], [0], [1], [0, 0, 1, 1], [], []>} : vector<2x128xbf16>, vector<128x128xbf16>, vector<2x128xf32> -> vector<2x128xf32>
    %c0_15 = arith.constant 0 : index
    %c0_16 = arith.constant 0 : index
    %19 = vector.load %arg6[%c0_15, %c0_16] : memref<1x128xf32, #tpu.memory_space<vmem>>, vector<1x128xf32>
    %20 = vector.broadcast %19 : vector<1x128xf32> to vector<2x128xf32>
    %21 = arith.addf %18, %20 : vector<2x128xf32>
    %22 = vector.extract_strided_slice %21 {offsets = [0, 0], sizes = [2, 2], strides = [1, 1]} : vector<2x128xf32> to vector<2x2xf32>
    %cst_17 = arith.constant dense<0xFF800000> : vector<2xf32>
    %23 = vector.multi_reduction <maximumf>, %22, %cst_17 [1] : vector<2x2xf32> to vector<2xf32>
    %24 = vector.shape_cast %23 : vector<2xf32> to vector<2x1xf32>
    %25 = vector.broadcast %24 : vector<2x1xf32> to vector<2x2xf32>
    %26 = arith.subf %22, %25 : vector<2x2xf32>
    %27 = math.exp %26 : vector<2x2xf32>
    %cst_18 = arith.constant dense<0.000000e+00> : vector<2xf32>
    %28 = vector.multi_reduction <add>, %27, %cst_18 [1] : vector<2x2xf32> to vector<2xf32>
    %29 = vector.shape_cast %28 : vector<2xf32> to vector<2x1xf32>
    %30 = vector.broadcast %29 : vector<2x1xf32> to vector<2x2xf32>
    %31 = arith.divf %27, %30 : vector<2x2xf32>
    %c0_19 = arith.constant 0 : index
    %c0_20 = arith.constant 0 : index
    %32 = vector.load %arg7[%c0_19, %c0_20] : memref<2x128xf32, #tpu.memory_space<vmem>>, vector<2x128xf32>
    tpu.vector_store %arg7[%c0_19, %c0_20], %21 {strides = array<i32>} : memref<2x128xf32, #tpu.memory_space<vmem>>, vector<2x128xf32>,
    %c0_21 = arith.constant 0 : index
    %c0_22 = arith.constant 0 : index
    %33 = vector.load %arg7[%c0_21, %c0_22] : memref<2x128xf32, #tpu.memory_space<vmem>>, vector<2x2xf32>
    tpu.vector_store %arg7[%c0_21, %c0_22], %31 {strides = array<i32>} : memref<2x128xf32, #tpu.memory_space<vmem>>, vector<2x2xf32>,
    return
  }
}

</mosaic_0001>

<bundles_post_ra>
// kernel: rcnn_forward.2
= control target key start
LH: loop header
LB: loop body
LE: loop exit
PB: predicated region body
PF: predicated region fallthrough
CT: control target
= control target key end

     0   :  { %s2412_s29 = smov 0   ;;  %s3207_s0 = inlined_call_operand.vmem [shape: bf16[2,27,1024], index: 0, kind: input, shape index: {}]   ;;  %s3208_s1 = inlined_call_operand.vmem [shape: bf16[8,27], index: 1, kind: input, shape index: {}]   ;;  %s3209_s2 = inlined_call_operand.vmem [shape: f32[8,1], index: 2, kind: input, shape index: {}]   ;;  %s3210_s3 = inlined_call_operand.vmem [shape: bf16[8,72], index: 3, kind: input, shape index: {}]   ;;  %s3211_s4 = inlined_call_operand.vmem [shape: f32[8,1], index: 4, kind: input, shape index: {}]   ;;  %s3212_s5 = inlined_call_operand.vmem [shape: bf16[1,8], index: 5, kind: input, shape index: {}]   ;;  %s3213_s6 = inlined_call_operand.<no memory space> [shape: f32[1,1], index: 6, kind: input, shape index: {}]   ;;  %s3214_s7 = inlined_call_operand.vmem [shape: bf16[2,8,1024], index: 7, kind: output, shape index: {0}]   ;;  %s3215_s8 = inlined_call_operand.vmem [shape: s32[2,1,1], index: 8, kind: output, shape index: {1}]  }
   0x1   :  { %v14_v0 = vstv %s3213_s6 }
   0x2   :  { %15 = vst [vmem:[#allocation4] sm:$0x1] %v14_v0 }
   0x3 LB: > { %s2219_s30 = sadd.s32 4294967295, %s2351_s29   ;;  %p2223_p0 = scmp.ge.s32.totalorder %s2351_s29, 1  ;;  %s2351_s29 = sphi %s2412_s29, %s21_s29  }
   0x4   : > { %p267_p1 = scmp.lt.s32.totalorder %s2351_s29, 3 }
   0x6   : > { %p268_p2 = pnand %p2223_p0, %p267_p1 }
   0x7   : > { %p304_p3 = scmp.lt.s32.totalorder (!%p268_p2), %s2219_s30, 1  ;;  %vm419_vm0 = vcmask (!%p268_p2), 1044480   ;;  %v337_v1 = vld [vmem:[%s3209_s2] sm:$0xff] (!%p268_p2)  ;;  %v2353_v2 = vmov (!%p268_p2), 0   ;;  %v684_v3 = vlaneseq (!%p268_p2)  ;;  %vm420_vm1 = vcmask (!%p268_p2), 1045504   ;;  %s2355_s16 = smov (!%p268_p2), 31  }
   0x8   : > { %271 = sbr.rel (%p268_p2) target bundleno = 1483 (0x5cb), region = 48  ;;  %479 = vmatprep.mubr.bf16.mxu0 (!%p268_p2), %v2353_v2  ;;  %520 = vmatprep.mubr.bf16.mxu1 (!%p268_p2), %v2353_v2  ;;  %v2354_v4 = vmov (!%p268_p2), 65535   ;;  %vm415_vm2 = vcmask (!%p268_p2), 220160   ;;  %v336_v54 = vld [vmem:[%s3208_s1] sm:$0xf] (!%p268_p2)  ;;  %s2356_s17 = smov (!%p268_p2), 33  }
   0x9   : > { %2343 = vset.pattern.permute.xlu0 (!%p268_p2), %v2353_v2  ;;  %2344 = vset.pattern.permute.xlu1 (!%p268_p2), %v2353_v2  ;;  %v421_v5 = vsel (!%p268_p2), %vm419_vm0, 4294967295, %v2354_v4  ;;  %v2430_v6 = vand.u32 (!%p268_p2), 127, %v684_v3  ;;  %s2357_s18 = smov (!%p268_p2), 63   ;;  %s2358_s19 = smov (!%p268_p2), 65  }
   0xa   : > { %340 = vperm.xlu0 (!%p268_p2), %2343, %v337_v1   ;;  %v2448_v13 = vsel (!%p268_p2), %vm420_vm1, %v421_v5, 0  ;;  %s2359_s20 = smov (!%p268_p2), 95   ;;  %s2360_s21 = smov (!%p268_p2), 97  }
   0xb   : > { %v2439_v7 = vadd.s32 (!%p268_p2), 128, %v2430_v6  ;;  %v697_v8 = vand.u32 (!%p268_p2), 31, %v2430_v6  ;;  %v2443_v9 = vadd.s32 (!%p268_p2), 256, %v2430_v6  ;;  %v2451_v14 = vadd.s32 (!%p268_p2), 384, %v2430_v6  ;;  %s2361_s22 = smov (!%p268_p2), 64   ;;  %s2362_s23 = smov (!%p268_p2), 96  }
   0xc   : > { %v2481_v42 = vadd.s32 (!%p268_p2), 512, %v2430_v6  ;;  %v2491_v47 = vadd.s32 (!%p268_p2), 640, %v2430_v6  ;;  %s2363_s24 = smov (!%p268_p2), 32  }
   0xd   : > { %v704_v20 = vand.u32 (!%p268_p2), 31, %v2439_v7  ;;  %vm2459_vm3 = vcmp.ne.s32.totalorder (!%p268_p2), %v697_v8, 0  ;;  %v711_v35 = vand.u32 (!%p268_p2), 31, %v2443_v9  ;;  %v718_v41 = vand.u32 (!%p268_p2), 31, %v2451_v14 }
   0xe   : > { %v725_v58 = vand.u32 (!%p268_p2), 31, %v2481_v42  ;;  %v732_v61 = vand.u32 (!%p268_p2), 31, %v2491_v47  ;;  %vm2508_vm9 = vcmp.ne.s32.totalorder (!%p268_p2), %v697_v8, 31 }
   0xf   : > { %s3243_s30 = smov (!%p304_p3, %s2219_s30), 1  ;;  %vm2469_vm4 = vcmp.ne.s32.totalorder %v704_v20, 0  ;;  %vm791_vm6 = vcmp.ne.s32.totalorder %v711_v35, 0  ;;  %vm792_vm7 = vcmp.ne.s32.totalorder %v718_v41, 0  ;;  %vm2517_vm11 = vcmp.ne.s32.totalorder %v704_v20, 31 }
  0x10   : > { %s2314_s10 = sshll.u32 %s3243_s30, 7  ;;  %vm826_vm5 = vmpackc.low %vm2469_vm4, %vm2459_vm3  ;;  %vm2513_vm10 = vcmp.ne.s32.totalorder %v725_v58, 0  ;;  %vm2521_vm12 = vcmp.ne.s32.totalorder %v711_v35, 31  ;;  %vm2525_vm13 = vcmp.ne.s32.totalorder %v718_v41, 31  ;;  %vm794_vm14 = vcmp.ne.s32.totalorder %v732_v61, 0  ;;  %s2315_s9 = sshll.u32 %s3243_s30, 5 }
  0x11   : > { %s2436_s13 = scalar_lea.vmem %s3207_s0, %s2314_s10  ;;  %v2494_v53 = vsel %vm826_vm5, 65537, %v2353_v2  ;;  %vm827_vm8 = vmpackc.low %vm792_vm7, %vm791_vm6  ;;  %vm2534_vm0 = vcmp.ne.s32.totalorder %v725_v58, 31  ;;  %vm2538_vm1 = vcmp.ne.s32.totalorder %v732_v61, 31  ;;  %vm621_vm6 = vcmask 1043968   ;;  %s3152_s11 = scalar_lea.vmem %s3214_s7, %s2315_s9 }
  0x12   : > { %v320_v10 = vld [vmem:[%s2436_s13] sm:$0xff]  ;;  %v321_v12 = vld [vmem:[%s2436_s13 + $0x8] sm:$0xff]  ;;  %v322_v28 = vld [vmem:[%s2436_s13 + $0x10] sm:$0xff]  ;;  %834 = vrot.lane.b32.xlu0 %v2494_v53, %s2355_s16  ;;  %v831_v60 = vsel %vm827_vm8, 65537, %v2353_v2  ;;  %622 = vst.msk [vmem:[#allocation2 + $0x20] sm:$0xf] %vm621_vm6, %v2353_v2 }
  0x13   : > { %v324_v11 = vld [vmem:[%s2436_s13 + $0x20] sm:$0xff]  ;;  %v325_v16 = vld [vmem:[%s2436_s13 + $0x28] sm:$0xff]  ;;  %v326_v31 = vld [vmem:[%s2436_s13 + $0x30] sm:$0xff]  ;;  %836 = vrot.lane.b32.xlu1 %v831_v60, %s2355_s16 }
  0x14   : > { %v2229_v15 = vcombine.high %v320_v10, %v324_v11  ;;  %v2228_v17 = vcombine.low %v320_v10, %v324_v11  ;;  %v328_v18 = vld [vmem:[%s2436_s13 + $0x40] sm:$0xff]  ;;  %v2231_v22 = vcombine.high %v321_v12, %v325_v16  ;;  %v2230_v23 = vcombine.low %v321_v12, %v325_v16  ;;  %v329_v25 = vld [vmem:[%s2436_s13 + $0x48] sm:$0xff]  ;;  %v323_v32 = vld [vmem:[%s2436_s13 + $0x18] sm:$0xff] }
  0x15   : > { %v332_v19 = vld [vmem:[%s2436_s13 + $0x60] sm:$0x33]  ;;  %v333_v26 = vld [vmem:[%s2436_s13 + $0x68] sm:$0x33]  ;;  %v327_v33 = vld [vmem:[%s2436_s13 + $0x38] sm:$0xff]  ;;  %v2233_v45 = vcombine.high %v322_v28, %v326_v31  ;;  %v2232_v48 = vcombine.low %v322_v28, %v326_v31 }
  0x16   : > { %v2237_v24 = vcombine.high %v328_v18, %v332_v19  ;;  %v2236_v27 = vcombine.low %v328_v18, %v332_v19  ;;  %447 = vmatprep.subr.bf16.mxu0 %v2229_v15  ;;  %v2239_v29 = vcombine.high %v329_v25, %v333_v26  ;;  %v2238_v30 = vcombine.low %v329_v25, %v333_v26  ;;  %v330_v38 = vld [vmem:[%s2436_s13 + $0x50] sm:$0xff]  ;;  %v331_v40 = vld [vmem:[%s2436_s13 + $0x58] sm:$0xff]  ;;  %vm964_vm15 = vmpackc.low %vm2517_vm11, %vm2508_vm9 }
  0x17   : > { %488 = vmatprep.subr.bf16.mxu1 %v2231_v22  ;;  %448 = vmatpush1.bf16.msra.mxu0 %v2228_v17  ;;  %v334_v39 = vld [vmem:[%s2436_s13 + $0x70] sm:$0x33]  ;;  %v335_v46 = vld [vmem:[%s2436_s13 + $0x78] sm:$0x33]  ;;  %v2234_v49 = vcombine.low %v323_v32, %v327_v33  ;;  %v2235_v50 = vcombine.high %v323_v32, %v327_v33  ;;  %vm828_vm3 = vmpackc.low %vm794_vm14, %vm2513_vm10  ;;  %v2549_v15 = vsel %vm964_vm15, 65537, %v2353_v2  ;;  %v2594_v26 = vadd.s32 768, %v2430_v6 }
  0x18   : > { %v427_v36 = vand.u32 %v2237_v24, %v2448_v13  ;;  %v424_v37 = vand.u32 %v2236_v27, %v2448_v13  ;;  %489 = vmatpush1.bf16.msra.mxu1 %v2230_v23  ;;  %v433_v43 = vand.u32 %v2239_v29, %v2448_v13  ;;  %v430_v44 = vand.u32 %v2238_v30, %v2448_v13  ;;  %vm965_vm4 = vmpackc.low %vm2525_vm13, %vm2521_vm12 }
  0x19   : > { %v2241_v51 = vcombine.high %v330_v38, %v334_v39  ;;  %v2243_v52 = vcombine.high %v331_v40, %v335_v46  ;;  %v2240_v55 = vcombine.low %v330_v38, %v334_v39  ;;  %v2242_v57 = vcombine.low %v331_v40, %v335_v46  ;;  %vm966_vm5 = vmpackc.low %vm2538_vm1, %vm2534_vm0  ;;  %972 = vrot.lane.b32.xlu1 %v2549_v15, %s2356_s17 }
  0x1a   : > { %449 = vmatprep.subr.bf16.mxu0 %v427_v36  ;;  %490 = vmatprep.subr.bf16.mxu1 %v433_v43  ;;  %v832_v12 = vsel %vm828_vm3, 65537, %v2353_v2  ;;  %v2566_v16 = vsel %vm966_vm5, 65537, %v2353_v2  ;;  %v2597_v27 = vadd.s32 896, %v2430_v6  ;;  %vm677_vm13 = vcmask 1047556  }
  0x1b   : > { %450 = vmatpush1.bf16.msra.mxu0 %v424_v37  ;;  %v439_v56 = vand.u32 %v2241_v51, %v2448_v13  ;;  %v445_v59 = vand.u32 %v2243_v52, %v2448_v13  ;;  %v436_v10 = vand.u32 %v2240_v55, %v2448_v13  ;;  %v442_v11 = vand.u32 %v2242_v57, %v2448_v13  ;;  %vm678_vm15 = vmor %vm677_vm13, %vm621_vm6 }
  0x1c   : > { %491 = vmatpush1.bf16.msra.mxu1 %v430_v44  ;;  %529 = vmatprep.subr.bf16.mxu0 %v2233_v45  ;;  %v969_v13 = vsel %vm965_vm4, 65537, %v2353_v2  ;;  %v739_v37 = vand.u32 31, %v2594_v26  ;;  %v746_v38 = vand.u32 31, %v2597_v27  ;;  %vm663_vm14 = vcmask 523264  }
  0x1d   : > { %570 = vmatprep.subr.bf16.mxu1 %v2235_v50  ;;  %838 = vrot.lane.b32.xlu0 %v832_v12, %s2355_s16  ;;  %vm665_vm0 = vcmask 1043456   ;;  %vm846_vm1 = vcmask 252928   ;;  %vm1056_vm3 = vcmask 515072   ;;  %vm984_vm5 = vcmask 269312  }
  0x1e   : > { %2244 = vmatmul.mubr.msk.bf16.vlgmr.msra.gmra.mrb[0].mxu0 %vm415_vm2, %v336_v54  ;;  %976 = vrot.lane.b32.xlu1 %v2566_v16, %s2356_s17  ;;  %vm2603_vm7 = vcmp.ne.s32.totalorder %v739_v37, 0  ;;  %vm2607_vm8 = vcmp.ne.s32.totalorder %v746_v38, 0  ;;  %vm2611_vm9 = vcmp.ne.s32.totalorder %v739_v37, 31  ;;  %vm2615_vm10 = vcmp.ne.s32.totalorder %v746_v38, 31 }
  0x1f   : > { %2245 = vmatmul.mubr.msk.bf16.vlgmr.msra.gmra.mrb[0].mxu1 %vm415_vm2, %v336_v54  ;;  %530 = vmatpush1.bf16.msra.mxu0 %v2232_v48  ;;  %vm829_vm11 = vmpackc.low %vm2607_vm8, %vm2603_vm7  ;;  %vm1023_vm7 = vcmask 777216  }
  0x20   : > { %571 = vmatpush1.bf16.msra.mxu1 %v2234_v49  ;;  %531 = vmatprep.subr.bf16.mxu0 %v439_v56  ;;  %vm967_vm12 = vmpackc.low %vm2615_vm10, %vm2611_vm9  ;;  %v833_v0 = vsel %vm829_vm11, 65537, %v2353_v2  ;;  %vm1095_vm9 = vcmask 531456  }
  0x21   : > { %572 = vmatprep.subr.bf16.mxu1 %v445_v59  ;;  %561 = vmatprep.mubr.bf16.mxu0 %v2353_v2  ;;  %v971_v1 = vsel %vm967_vm12, 65537, %v2353_v2  ;;  %vm885_vm12 = vcmask 793600  }
  0x22   : > { %602 = vmatprep.mubr.bf16.mxu1 %v2353_v2  ;;  %974 = vrot.lane.b32.xlu0 %v969_v13, %s2356_s17 }
  0x23   : > { %532 = vmatpush1.bf16.msra.mxu0 %v436_v10  ;;  %1046 = vrot.lane.b32.xlu1 %v831_v60, %s2357_s18 }
  0x24   : > { %573 = vmatpush1.bf16.msra.mxu1 %v442_v11 }
  0x26   : > { %2246 = vmatmul.mubr.msk.bf16.vlgmr.msra.gmra.mrb[4].mxu0 %vm415_vm2, %v336_v54  ;;  %1044 = vrot.lane.b32.xlu0 %v2494_v53, %s2357_s18 }
  0x27   : > { %2247 = vmatmul.mubr.msk.bf16.vlgmr.msra.gmra.mrb[4].mxu1 %vm415_vm2, %v336_v54  ;;  %1688 = vmatprep.mubr.bf16.mxu0 %v2353_v2  ;;  %vm619_vm2 = vcmask 519168  }
  0x28   : > { %1729 = vmatprep.mubr.bf16.mxu1 %v2353_v2  ;;  %1157 = vrot.lane.b32.xlu1 %v2549_v15, %s2358_s19  ;;  %620 = vst.msk [vmem:[#allocation2] sm:$0xf] %vm619_vm2, %v2353_v2 }
  0x2a   : > { %1048 = vrot.lane.b32.xlu0 %v832_v12, %s2357_s18 }
  0x2c   : > { %1161 = vrot.lane.b32.xlu1 %v2566_v16, %s2358_s19 }
  0x2e   : > { %1159 = vrot.lane.b32.xlu0 %v969_v13, %s2358_s19 }
  0x30   : > { %1229 = vrot.lane.b32.xlu1 %v831_v60, %s2359_s20 }
  0x32   : > { %1227 = vrot.lane.b32.xlu0 %v2494_v53, %s2359_s20 }
  0x34   : > { %1341 = vrot.lane.b32.xlu1 %v969_v13, %s2360_s21 }
  0x36   : > { %1231 = vrot.lane.b32.xlu0 %v832_v12, %s2359_s20 }
  0x85   : > { %v2641_v4 = vpop.permute.xlu1 %836 }
  0x86   : > { %v843_v50 = vrot.slane %v2641_v4, 4 }
  0x89   : > { %v341_v17 = vpop.permute.xlu0 %340 }
  0x8b   : > { %v2645_v8 = vpop.permute.xlu1 %972 }
  0x8d   : > { %v2643_v5 = vpop.permute.xlu0 %834 }
  0x90   : > { %v2649_v11 = vpop.permute.xlu1 %976 }
  0x91   : > { %v2647_v10 = vpop.permute.xlu0 %838 }
  0x95   : > { %v2651_v12 = vpop.permute.xlu0 %974 }
  0x99   : > { %v2655_v13 = vpop.permute.xlu0 %1044 }
  0x9a   : > { %v1052_v37 = vrot.slane %v2655_v13, 4 }
  0xf1   : > { %v481_v18 = vpop.f32.mrb[0].mxu0 }
  0xf2   : > { %v482_v19 = vadd.f32 %v481_v18, %v341_v17  ;;  %v522_v20 = vpop.f32.mrb[0].mxu1  ;;  %v483_v21 = vpop.f32.mrb[1].mxu0 }
  0xf3   : > { %v523_v22 = vadd.f32 %v522_v20, %v341_v17  ;;  %v484_v23 = vadd.f32 %v483_v21, %v341_v17  ;;  %v524_v24 = vpop.f32.mrb[1].mxu1  ;;  %v485_v25 = vpop.f32.mrb[2].mxu0 }
  0xf4   : > { %v611_v28 = vmax.f32 %v482_v19, 0.0  ;;  %v525_v29 = vadd.f32 %v524_v24, %v341_v17  ;;  %v486_v30 = vpop.f32.mrb[3].mxu0  ;;  %v526_v31 = vpop.f32.mrb[2].mxu1 }
  0xf5   : > { %v613_v32 = vmax.f32 %v523_v22, 0.0  ;;  %v612_v33 = vmax.f32 %v484_v23, 0.0  ;;  %v527_v34 = vpop.f32.mrb[3].mxu1 }
  0xf6   : > { %v614_v35 = vmax.f32 %v525_v29, 0.0 }
  0xf7   : > { %v2316_v36 = vpack.c.bf16 %v612_v33, %v611_v28  ;;  %v842_v33 = vrot.slane %v2643_v5, 4 }
  0xf8   : > { %v2317_v39 = vpack.c.bf16 %v614_v35, %v613_v32 }
  0xf9   : > { %v563_v40 = vpop.f32.mrb[4].mxu0  ;;  %651 = vrot.lane.b32.xlu0 %v2316_v36, %s2361_s22  ;;  %v847_v36 = vsel %vm846_vm1, %v842_v33, %v2643_v5 }
  0xfa   : > { %v604_v41 = vpop.f32.mrb[4].mxu1  ;;  %653 = vrot.lane.b32.xlu1 %v2317_v39, %s2361_s22  ;;  %v564_v43 = vadd.f32 %v563_v40, %v341_v17  ;;  %v565_v44 = vpop.f32.mrb[5].mxu0  ;;  %vm854_vm4 = vcmp.ne.s16.totalorder %v847_v36, 0 }
  0xfb   : > { %v605_v45 = vadd.f32 %v604_v41, %v341_v17  ;;  %v566_v46 = vadd.f32 %v565_v44, %v341_v17  ;;  %v606_v48 = vpop.f32.mrb[5].mxu1  ;;  %v567_v49 = vpop.f32.mrb[6].mxu0 }
  0xfc   : > { %v615_v52 = vmax.f32 %v564_v43, 0.0  ;;  %v607_v53 = vadd.f32 %v606_v48, %v341_v17  ;;  %v568_v56 = vpop.f32.mrb[7].mxu0  ;;  %v608_v57 = vpop.f32.mrb[6].mxu1  ;;  %v1057_v43 = vsel %vm1056_vm3, %v1052_v37, %v2655_v13 }
  0xfd   : > { %v617_v58 = vmax.f32 %v605_v45, 0.0  ;;  %v616_v59 = vmax.f32 %v566_v46, 0.0  ;;  %1339 = vrot.lane.b32.xlu0 %v2549_v15, %s2360_s21  ;;  %v609_v60 = vpop.f32.mrb[7].mxu1  ;;  %v2653_v15 = vpop.permute.xlu1 %1046  ;;  %v980_v46 = vrot.slane %v2645_v8, 4  ;;  %vm1064_vm6 = vcmp.ne.s16.totalorder %v1057_v43, 0 }
  0xfe   : > { %v618_v61 = vmax.f32 %v607_v53, 0.0  ;;  %v2659_v17 = vpop.permute.xlu0 %1048 }
  0xff   : > { %v2318_v62 = vpack.c.bf16 %v616_v59, %v615_v52  ;;  %v1054_v48 = vrot.slane %v2659_v17, 4  ;;  %v985_v51 = vsel %vm984_vm5, %v980_v46, %v2645_v8  ;;  %v848_v59 = vsel %vm665_vm0, %v842_v33, %v843_v50 }
 0x100   : > { %v2319_v63 = vpack.c.bf16 %v618_v61, %v617_v58  ;;  %vm992_vm8 = vcmp.ne.s16.totalorder %v985_v51, 0  ;;  %v981_v58 = vrot.slane %v2651_v12, 4  ;;  %v849_v5 = vsel %vm846_vm1, %v848_v59, %v2641_v4 }
 0x101   : > { %655 = vrot.lane.b32.xlu1 %v2318_v62, %s2361_s22  ;;  %1343 = vrot.lane.b32.xlu0 %v2566_v16, %s2360_s21  ;;  %v2657_v16 = vpop.permute.xlu1 %1157  ;;  %vm855_vm13 = vcmp.ne.s16.totalorder %v849_v5, 0  ;;  %v844_v5 = vrot.slane %v2647_v10, 4 }
 0x102   : > { %v2663_v19 = vpop.permute.xlu0 %1159  ;;  %v1165_v57 = vrot.slane %v2657_v16, 4  ;;  %v986_v8 = vsel %vm665_vm0, %v980_v46, %v981_v58 }
 0x104   : > { %v1169_v60 = vsel %vm1095_vm9, %v1165_v57, %v2657_v16 }
 0x105   : > { %840 = vrot.lane.b32.xlu1 %v833_v0, %s2355_s16  ;;  %978 = vrot.lane.b32.xlu0 %v971_v1, %s2356_s17  ;;  %v2661_v18 = vpop.permute.xlu1 %1161  ;;  %vm1176_vm10 = vcmp.ne.s16.totalorder %v1169_v60, 0 }
 0x106   : > { %v2667_v21 = vpop.permute.xlu0 %1227 }
 0x107   : > { %v1235_v52 = vrot.slane %v2667_v21, 4 }
 0x109   : > { %1050 = vrot.lane.b32.xlu1 %v833_v0, %s2357_s18  ;;  %1163 = vrot.lane.b32.xlu0 %v971_v1, %s2358_s19  ;;  %v2665_v20 = vpop.permute.xlu1 %1229  ;;  %v1239_v61 = vsel %vm1023_vm7, %v1235_v52, %v2667_v21 }
 0x10a   : > { %v2671_v23 = vpop.permute.xlu0 %1231  ;;  %vm1246_vm11 = vcmp.ne.s16.totalorder %v1239_v61, 0 }
 0x10d   : > { %1233 = vrot.lane.b32.xlu1 %v833_v0, %s2359_s20  ;;  %1345 = vrot.lane.b32.xlu0 %v971_v1, %s2360_s21  ;;  %v2669_v22 = vpop.permute.xlu1 %1341 }
 0x10e   : > { %v1348_v33 = vrot.slane %v2669_v22, 4 }
 0x111   : > { %657 = vrot.lane.b32.xlu1 %v2319_v63, %s2361_s22 }
 0x16b   : > { %v652_v24 = vpop.permute.xlu0 %651 }
 0x16c   : > { %v654_v25 = vpop.permute.xlu1 %653  ;;  %v659_v28 = vrot.slane %v652_v24, 4 }
 0x16d   : > { %v660_v29 = vrot.slane %v654_v25, 4 }
 0x16e   : > { %v664_v30 = vsel %vm663_vm14, %v659_v28, %v652_v24 }
 0x16f   : > { %v666_v31 = vsel %vm665_vm0, %v659_v28, %v660_v29  ;;  %679 = vst.msk [vmem:[#allocation2] sm:$0xff] %vm678_vm15, %v664_v30  ;;  %v1340_v63 = vpop.permute.xlu0 %1339  ;;  %v1053_v28 = vrot.slane %v2653_v15, 4 }
 0x170   : > { %v2677_v32 = vsel %vm663_vm14, %v666_v31, %v654_v25  ;;  %v1347_v16 = vrot.slane %v1340_v63, 4 }
 0x171   : > { %v1058_v36 = vsel %vm665_vm0, %v1052_v37, %v1053_v28 }
 0x172   : > { %v1351_v31 = vsel %vm885_vm12, %v1347_v16, %v1340_v63  ;;  %v1059_v13 = vsel %vm1056_vm3, %v1058_v36, %v2653_v15 }
 0x173   : > { %v656_v34 = vpop.permute.xlu1 %655 }
 0x174   : > { %v661_v35 = vrot.slane %v656_v34, 4 }
 0x176   : > { %v668_v38 = vsel %vm665_vm0, %v660_v29, %v661_v35  ;;  %v2684_v39 = vld [vmem:[#allocation2] sm:$0xff]  ;;  %v1236_v29 = vrot.slane %v2665_v20, 4 }
 0x177   : > { %v2687_v40 = vsel %vm663_vm14, %v668_v38, %v656_v34  ;;  %v2689_v41 = vpop.permute.xlu1 %840  ;;  %1121 = vrot.lane.b32.xlu1 %v2684_v39, %s2361_s22  ;;  %911 = vrot.lane.b32.xlu0 %v2684_v39, %s2362_s23  ;;  %v859_v44 = vsel %vm854_vm4, %v2684_v39, 0  ;;  %v1069_v54 = vsel %vm1064_vm6, %v2684_v39, 0  ;;  %v997_v62 = vsel %vm992_vm8, %v2684_v39, 0 }
 0x178   : > { %v1181_v24 = vsel %vm1176_vm10, %v2684_v39, 0  ;;  %v1251_v25 = vsel %vm1246_vm11, %v2684_v39, 0  ;;  %v987_v34 = vsel %vm984_vm5, %v986_v8, %v2651_v12  ;;  %v1166_v38 = vrot.slane %v2663_v19, 4 }
 0x179   : > { %v1240_v43 = vsel %vm665_vm0, %v1235_v52, %v1236_v29  ;;  %vm993_vm15 = vcmp.ne.s16.totalorder %v987_v34, 0  ;;  %vm1065_vm4 = vcmp.ne.s16.totalorder %v1059_v13, 0 }
 0x17a   : > { %v1241_v37 = vsel %vm1023_vm7, %v1240_v43, %v2665_v20  ;;  %v998_v46 = vsel %vm993_vm15, %v2677_v32, 0  ;;  %v1170_v52 = vsel %vm665_vm0, %v1165_v57, %v1166_v38  ;;  %v1070_v59 = vsel %vm1065_vm4, %v2677_v32, 0 }
 0x17b   : > { %v2700_v45 = vpop.permute.xlu1 %1050  ;;  %1302 = vrot.lane.b32.xlu0 %v2684_v39, %s2363_s24  ;;  %869 = vrot.lane.b32.xlu1 %v859_v44, %s2360_s21  ;;  %v1352_v44 = vsel %vm665_vm0, %v1347_v16, %v1348_v33  ;;  %vm1247_vm6 = vcmp.ne.s16.totalorder %v1241_v37, 0  ;;  %v1171_v15 = vsel %vm1095_vm9, %v1170_v52, %v2663_v19  ;;  %v850_v16 = vsel %vm665_vm0, %v843_v50, %v844_v5 }
 0x17c   : > { %v1055_v49 = vrot.slane %v2700_v45, 4  ;;  %vm1177_vm10 = vcmp.ne.s16.totalorder %v1171_v15, 0 }
 0x17d   : > { %v1182_v60 = vsel %vm1177_vm10, %v2677_v32, 0 }
 0x17e   : > { %v1062_v53 = vsel %vm665_vm0, %v1054_v48, %v1055_v49 }
 0x17f   : > { %v2720_v55 = vsel %vm1056_vm3, %v1062_v53, %v2700_v45  ;;  %v2722_v56 = vpop.permute.xlu1 %1233  ;;  %1079 = vrot.lane.b32.xlu0 %v1069_v54, %s2358_s19  ;;  %913 = vrot.lane.b32.xlu1 %v2677_v32, %s2362_s23  ;;  %v1353_v53 = vsel %vm885_vm12, %v1352_v44, %v2669_v22  ;;  %v1252_v54 = vsel %vm1247_vm6, %v2677_v32, 0 }
 0x180   : > { %vm1359_vm8 = vcmp.ne.s16.totalorder %v1353_v53, 0  ;;  %v1238_v53 = vrot.slane %v2722_v56, 4 }
 0x181   : > { %v1364_v57 = vsel %vm1359_vm8, %v2677_v32, 0  ;;  %vm1068_vm8 = vcmp.ne.s16.totalorder %v1055_v49, 0 }
 0x183   : > { %v658_v0 = vpop.permute.xlu1 %657  ;;  %1123 = vrot.lane.b32.xlu0 %v2677_v32, %s2361_s22  ;;  %1007 = vrot.lane.b32.xlu1 %v997_v62, %s2359_s20  ;;  %v845_v62 = vrot.slane %v2689_v41, 4 }
 0x184   : > { %v662_v1 = vrot.slane %v658_v0, 4 }
 0x185   : > { %vm858_vm11 = vcmp.ne.s16.totalorder %v845_v62, 0  ;;  %v852_v36 = vsel %vm665_vm0, %v844_v5, %v845_v62 }
 0x186   : > { %v670_v21 = vsel %vm665_vm0, %v661_v35, %v662_v1  ;;  %683 = vst.msk [vmem:[#allocation2 + $0x20] sm:$0xf] %vm619_vm2, %v662_v1  ;;  %v860_v35 = vsel %vm855_vm13, %v2677_v32, 0  ;;  %vm1358_vm2 = vcmp.ne.s16.totalorder %v1351_v31, 0  ;;  %v851_v31 = vsel %vm846_vm1, %v850_v16, %v2647_v10 }
 0x187   : > { %v2752_v30 = vsel %vm663_vm14, %v670_v21, %v658_v0  ;;  %1191 = vrot.lane.b32.xlu0 %v1181_v24, %s2357_s18  ;;  %1261 = vrot.lane.b32.xlu1 %v1251_v25, %s2356_s17  ;;  %v1363_v51 = vsel %vm1358_vm2, %v2684_v39, 0  ;;  %v2791_v39 = vpop.permute.xlu0 %1343  ;;  %v982_v21 = vrot.slane %v2649_v11, 4  ;;  %v1060_v24 = vsel %vm665_vm0, %v1053_v28, %v1054_v48 }
 0x188   : > { %v1167_v25 = vrot.slane %v2661_v18, 4  ;;  %v1061_v4 = vsel %vm1056_vm3, %v1060_v24, %v2659_v17  ;;  %vm856_vm2 = vcmp.ne.s16.totalorder %v851_v31, 0  ;;  %v1349_v28 = vrot.slane %v2791_v39, 4 }
 0x189   : > { %v988_v50 = vsel %vm665_vm0, %v981_v58, %v982_v21  ;;  %vm1066_vm15 = vcmp.ne.s16.totalorder %v1061_v4, 0  ;;  %v861_v48 = vsel %vm856_vm2, %v2687_v40, 0  ;;  %v1237_v58 = vrot.slane %v2671_v23, 4 }
 0x18a   : > { %v1172_v34 = vsel %vm665_vm0, %v1166_v38, %v1167_v25  ;;  %v989_v10 = vsel %vm984_vm5, %v988_v50, %v2649_v11  ;;  %v1071_v12 = vsel %vm1066_vm15, %v2687_v40, 0  ;;  %v1354_v43 = vsel %vm665_vm0, %v1348_v33, %v1349_v28 }
 0x18b   : > { %871 = vrot.lane.b32.xlu0 %v860_v35, %s2360_s21  ;;  %1304 = vrot.lane.b32.xlu1 %v2677_v32, %s2363_s24  ;;  %v979_v19 = vpop.permute.xlu0 %978  ;;  %v1173_v17 = vsel %vm1095_vm9, %v1172_v34, %v2661_v18  ;;  %vm994_vm4 = vcmp.ne.s16.totalorder %v989_v10, 0  ;;  %v1242_v18 = vsel %vm665_vm0, %v1236_v29, %v1237_v58  ;;  %v853_v20 = vsel %vm846_vm1, %v852_v36, %v2689_v41 }
 0x18c   : > { %v983_v0 = vrot.slane %v979_v19, 4  ;;  %vm1178_vm6 = vcmp.ne.s16.totalorder %v1173_v17, 0  ;;  %v999_v11 = vsel %vm994_vm4, %v2687_v40, 0  ;;  %v1243_v44 = vsel %vm1023_vm7, %v1242_v18, %v2671_v23 }
 0x18d   : > { %v905_v61 = vld [vmem:[#allocation2 + $0x20] sm:$0xf]  ;;  %v1183_v35 = vsel %vm1178_vm6, %v2687_v40, 0  ;;  %v1355_v22 = vsel %vm885_vm12, %v1354_v43, %v2791_v39  ;;  %vm1248_vm10 = vcmp.ne.s16.totalorder %v1243_v44, 0  ;;  %vm1067_vm15 = vcmp.ne.s16.totalorder %v2720_v55, 0 }
 0x18e   : > { %v809_v63 = vld [vmem:[#allocation2 + $0x20] sm:$0xf]  ;;  %vm996_vm13 = vcmp.ne.s16.totalorder %v983_v0, 0  ;;  %v990_v13 = vsel %vm665_vm0, %v982_v21, %v983_v0  ;;  %v1253_v41 = vsel %vm1248_vm10, %v2687_v40, 0  ;;  %v1072_v39 = vsel %vm1067_vm15, %v2752_v30, 0 }
 0x18f   : > { %1009 = vrot.lane.b32.xlu0 %v998_v46, %s2359_s20  ;;  %1373 = vrot.lane.b32.xlu1 %v1363_v51, %s2355_s16  ;;  %v863_v1 = vsel %vm858_vm11, %v809_v63, 0  ;;  %v947_v32 = vld [vmem:[#allocation2 + $0x20] sm:$0xf]  ;;  %v1164_v33 = vpop.permute.xlu0 %1163  ;;  %vm857_vm11 = vcmp.ne.s16.totalorder %v853_v20, 0  ;;  %v991_v45 = vsel %vm984_vm5, %v990_v13, %v979_v19  ;;  %vm1318_vm15 = vcmask 261120  }
 0x190   : > { %v1001_v8 = vsel %vm996_vm13, %v947_v32, 0  ;;  %v1043_v38 = vld [vmem:[#allocation2 + $0x20] sm:$0xf]  ;;  %v862_v23 = vsel %vm857_vm11, %v2752_v30, 0  ;;  %vm1360_vm13 = vcmp.ne.s16.totalorder %v1355_v22, 0  ;;  %v1168_v49 = vrot.slane %v1164_v33, 4 }
 0x191   : > { %v1073_v29 = vsel %vm1068_vm8, %v1043_v38, 0  ;;  %vm995_vm2 = vcmp.ne.s16.totalorder %v991_v45, 0  ;;  %v1365_v46 = vsel %vm1360_vm13, %v2687_v40, 0  ;;  %v1226_v62 = vld [vmem:[#allocation2 + $0x20] sm:$0xf]  ;;  %vm1250_vm8 = vcmp.ne.s16.totalorder %v1238_v53, 0 }
 0x192   : > { %v1000_v51 = vsel %vm995_vm2, %v2752_v30, 0  ;;  %v1174_v52 = vsel %vm665_vm0, %v1167_v25, %v1168_v49  ;;  %vm1180_vm4 = vcmp.ne.s16.totalorder %v1168_v49, 0  ;;  %v1255_v0 = vsel %vm1250_vm8, %v1226_v62, 0  ;;  %v1338_v32 = vld [vmem:[#allocation2 + $0x20] sm:$0xf] }
 0x193   : > { %1263 = vrot.lane.b32.xlu0 %v1252_v54, %s2356_s17  ;;  %1081 = vrot.lane.b32.xlu1 %v1070_v59, %s2358_s19  ;;  %v1346_v37 = vpop.permute.xlu0 %1345  ;;  %v1175_v54 = vsel %vm1095_vm9, %v1174_v52, %v1164_v33  ;;  %v1115_v59 = vld [vmem:[#allocation2 + $0x20] sm:$0xf]  ;;  %vm927_vm2 = vcmask 785408  }
 0x194   : > { %v1350_v15 = vrot.slane %v1346_v37, 4  ;;  %vm1179_vm6 = vcmp.ne.s16.totalorder %v1175_v54, 0 }
 0x196   : > { %vm1362_vm13 = vcmp.ne.s16.totalorder %v1350_v15, 0 }
 0x197   : > { %1375 = vrot.lane.b32.xlu0 %v1364_v57, %s2355_s16  ;;  %1193 = vrot.lane.b32.xlu1 %v1182_v60, %s2357_s18  ;;  %v1156_v57 = vld [vmem:[#allocation2 + $0x20] sm:$0xf]  ;;  %v1356_v60 = vsel %vm665_vm0, %v1349_v28, %v1350_v15  ;;  %v1367_v16 = vsel %vm1362_vm13, %v1338_v32, 0 }
 0x198   : > { %v1185_v19 = vsel %vm1180_vm4, %v1156_v57, 0  ;;  %v1357_v63 = vsel %vm885_vm12, %v1356_v60, %v1346_v37  ;;  %vm1627_vm4 = vcmask 588800  }
 0x199   : > { %vm1361_vm11 = vcmp.ne.s16.totalorder %v1357_v63, 0 }
 0x19a   : > { %v1366_v5 = vsel %vm1361_vm11, %v2752_v30, 0 }
 0x19b   : > { %915 = vrot.lane.b32.xlu0 %v2687_v40, %s2362_s23  ;;  %919 = vrot.lane.b32.xlu1 %v905_v61, %s2362_s23  ;;  %v1184_v61 = vsel %vm1179_vm6, %v2752_v30, 0 }
 0x19f   : > { %1306 = vrot.lane.b32.xlu0 %v2687_v40, %s2363_s24  ;;  %877 = vrot.lane.b32.xlu1 %v863_v1, %s2360_s21 }
 0x1a3   : > { %917 = vrot.lane.b32.xlu0 %v2752_v30, %s2362_s23  ;;  %1015 = vrot.lane.b32.xlu1 %v1001_v8, %s2359_s20  ;;  %v1441_v8 = vld [vmem:[%s3211_s4] sm:$0xff] }
 0x1a7   : > { %1127 = vrot.lane.b32.xlu0 %v2752_v30, %s2361_s22  ;;  %1125 = vrot.lane.b32.xlu1 %v2687_v40, %s2361_s22  ;;  %v1244_v40 = vsel %vm665_vm0, %v1237_v58, %v1238_v53 }
 0x1a8   : > { %v1245_v55 = vsel %vm1023_vm7, %v1244_v40, %v2722_v56  ;;  %v1296_v56 = vld [vmem:[#allocation2 + $0x20] sm:$0xf] }
 0x1a9   : > { %vm1249_vm10 = vcmp.ne.s16.totalorder %v1245_v55, 0 }
 0x1aa   : > { %v1254_v1 = vsel %vm1249_vm10, %v2752_v30, 0 }
 0x1ab   : > { %1083 = vrot.lane.b32.xlu0 %v1071_v12, %s2358_s19  ;;  %873 = vrot.lane.b32.xlu1 %v861_v48, %s2360_s21 }
 0x1af   : > { %1195 = vrot.lane.b32.xlu0 %v1183_v35, %s2357_s18  ;;  %1011 = vrot.lane.b32.xlu1 %v999_v11, %s2359_s20 }
 0x1b3   : > { %1308 = vrot.lane.b32.xlu0 %v2752_v30, %s2363_s24  ;;  %1087 = vrot.lane.b32.xlu1 %v1073_v29, %s2358_s19 }
 0x1b7   : > { %875 = vrot.lane.b32.xlu0 %v862_v23, %s2360_s21  ;;  %1265 = vrot.lane.b32.xlu1 %v1253_v41, %s2356_s17 }
 0x1bb   : > { %1377 = vrot.lane.b32.xlu1 %v1365_v46, %s2355_s16  ;;  %1013 = vrot.lane.b32.xlu0 %v1000_v51, %s2359_s20 }
 0x1bf   : > { %1129 = vrot.lane.b32.xlu1 %v1115_v59, %s2361_s22  ;;  %1085 = vrot.lane.b32.xlu0 %v1072_v39, %s2358_s19 }
 0x1c3   : > { %1199 = vrot.lane.b32.xlu1 %v1185_v19, %s2357_s18  ;;  %1197 = vrot.lane.b32.xlu0 %v1184_v61, %s2357_s18 }
 0x1c7   : > { %1269 = vrot.lane.b32.xlu1 %v1255_v0, %s2356_s17  ;;  %1267 = vrot.lane.b32.xlu0 %v1254_v1, %s2356_s17 }
 0x1cb   : > { %1310 = vrot.lane.b32.xlu1 %v1296_v56, %s2363_s24  ;;  %1379 = vrot.lane.b32.xlu0 %v1366_v5, %s2355_s16 }
 0x1cf   : > { %1381 = vrot.lane.b32.xlu1 %v1367_v16, %s2355_s16  ;;  %1444 = vperm.xlu0 %2343, %v1441_v8   ;;  %s316_s16 = scalar_lea.vmem %s3215_s8, %s3243_s30 }
 0x1e9   : > { %v1122_v21 = vpop.permute.xlu1 %1121  ;;  %v912_v24 = vpop.permute.xlu0 %911 }
 0x1ea   : > { %v921_v48 = vrot.slane %v912_v24, 4  ;;  %v1131_v23 = vrot.slane %v1122_v21, 4 }
 0x1ed   : > { %v870_v25 = vpop.permute.xlu1 %869  ;;  %v2895_v31 = vpop.permute.xlu0 %1302 }
 0x1ee   : > { %v879_v35 = vrot.slane %v870_v25, 4  ;;  %v1312_v15 = vrot.slane %v2895_v31, 4 }
 0x1f1   : > { %v2897_v30 = vpop.permute.xlu1 %913  ;;  %v1080_v4 = vpop.permute.xlu0 %1079 }
 0x1f2   : > { %v922_v12 = vrot.slane %v2897_v30, 4  ;;  %v1089_v37 = vrot.slane %v1080_v4, 4 }
 0x1f4   : > { %v926_v11 = vsel %vm665_vm0, %v921_v48, %v922_v12 }
 0x1f5   : > { %v1008_v50 = vpop.permute.xlu1 %1007  ;;  %v2899_v34 = vpop.permute.xlu0 %1123  ;;  %v928_v20 = vsel %vm927_vm2, %v912_v24, %v926_v11 }
 0x1f6   : > { %v1017_v33 = vrot.slane %v1008_v50, 4  ;;  %v1132_v45 = vrot.slane %v2899_v34, 4 }
 0x1f8   : > { %v1136_v54 = vsel %vm665_vm0, %v1131_v23, %v1132_v45 }
 0x1f9   : > { %v1262_v10 = vpop.permute.xlu1 %1261  ;;  %v1192_v17 = vpop.permute.xlu0 %1191  ;;  %v1137_v24 = vsel %vm663_vm14, %v1122_v21, %v1136_v54 }
 0x1fa   : > { %v1271_v53 = vrot.slane %v1262_v10, 4  ;;  %v1201_v40 = vrot.slane %v1192_v17, 4 }
 0x1fd   : > { %v2902_v58 = vpop.permute.xlu1 %1304  ;;  %v2904_v28 = vpop.permute.xlu0 %871 }
 0x1fe   : > { %v880_v18 = vrot.slane %v2904_v28, 4  ;;  %v1313_v59 = vrot.slane %v2902_v58, 4 }
 0x200   : > { %v884_v36 = vsel %vm665_vm0, %v879_v35, %v880_v18  ;;  %v1317_v56 = vsel %vm665_vm0, %v1312_v15, %v1313_v59 }
 0x201   : > { %v1374_v38 = vpop.permute.xlu1 %1373  ;;  %v2913_v43 = vpop.permute.xlu0 %1009  ;;  %v886_v44 = vsel %vm885_vm12, %v870_v25, %v884_v36  ;;  %v1319_v11 = vsel %vm1318_vm15, %v2895_v31, %v1317_v56 }
 0x202   : > { %v1018_v29 = vrot.slane %v2913_v43, 4  ;;  %v2252_v13 = vcombine.low %v886_v44, %v928_v20  ;;  %v2253_v22 = vcombine.high %v886_v44, %v928_v20  ;;  %v1383_v5 = vrot.slane %v1374_v38, 4 }
 0x204   : > { %1656 = vmatprep.subr.bf16.mxu0 %v2253_v22  ;;  %v1022_v46 = vsel %vm665_vm0, %v1017_v33, %v1018_v29 }
 0x205   : > { %v2919_v41 = vpop.permute.xlu1 %1081  ;;  %1657 = vmatpush1.bf16.msra.mxu0 %v2252_v13  ;;  %v2921_v49 = vpop.permute.xlu0 %1263  ;;  %v1024_v19 = vsel %vm1023_vm7, %v1008_v50, %v1022_v46 }
 0x206   : > { %v1090_v51 = vrot.slane %v2919_v41, 4  ;;  %v1272_v52 = vrot.slane %v2921_v49, 4 }
 0x208   : > { %v1094_v39 = vsel %vm665_vm0, %v1089_v37, %v1090_v51  ;;  %v1276_v57 = vsel %vm665_vm0, %v1271_v53, %v1272_v52 }
 0x209   : > { %v2939_v60 = vpop.permute.xlu1 %1193  ;;  %v2941_v55 = vpop.permute.xlu0 %1375  ;;  %v1096_v61 = vsel %vm1095_vm9, %v1080_v4, %v1094_v39  ;;  %v1277_v4 = vsel %vm984_vm5, %v1262_v10, %v1276_v57 }
 0x20a   : > { %v1202_v62 = vrot.slane %v2939_v60, 4  ;;  %v1384_v63 = vrot.slane %v2941_v55, 4  ;;  %v2260_v0 = vcombine.low %v1024_v19, %v1096_v61  ;;  %v2261_v1 = vcombine.high %v1024_v19, %v1096_v61 }
 0x20b   : > { %v2277_v36 = vcombine.high %v1277_v4, %v1319_v11  ;;  %v2276_v10 = vcombine.low %v1277_v4, %v1319_v11 }
 0x20c   : > { %v1206_v32 = vsel %vm665_vm0, %v1201_v40, %v1202_v62  ;;  %1658 = vmatprep.subr.bf16.mxu0 %v2261_v1  ;;  %v1388_v50 = vsel %vm665_vm0, %v1383_v5, %v1384_v63 }
 0x20d   : > { %v2951_v8 = vpop.permute.xlu1 %919  ;;  %1659 = vmatpush1.bf16.msra.mxu0 %v2260_v0  ;;  %v2953_v16 = vpop.permute.xlu0 %915  ;;  %v1207_v25 = vsel %vm1056_vm3, %v1192_v17, %v1206_v32  ;;  %v1389_v21 = vsel %vm846_vm1, %v1374_v38, %v1388_v50  ;;  %v2981_v38 = vld [vmem:[%s3210_s3] sm:$0xf] }
 0x20e   : > { %v2268_v48 = vcombine.low %v1137_v24, %v1207_v25  ;;  %v2269_v35 = vcombine.high %v1137_v24, %v1207_v25  ;;  %v2285_v17 = vcombine.high %v1389_v21, %v1389_v21  ;;  %v2284_v13 = vcombine.low %v1389_v21, %v1389_v21 }
 0x20f   : > { %v923_v46 = vrot.slane %v2953_v16, 4 }
 0x210   : > { %1660 = vmatprep.subr.bf16.mxu0 %v2269_v35  ;;  %v1633_v31 = vsel %vm665_vm0, %v2284_v13, 0 }
 0x211   : > { %v2963_v44 = vpop.permute.xlu1 %877  ;;  %1661 = vmatpush1.bf16.msra.mxu0 %v2268_v48  ;;  %v2965_v20 = vpop.permute.xlu0 %1306  ;;  %v929_v54 = vsel %vm665_vm0, %v922_v12, %v923_v46 }
 0x212   : > { %1662 = vmatprep.subr.bf16.mxu0 %v2277_v36  ;;  %v930_v56 = vsel %vm927_vm2, %v2897_v30, %v929_v54  ;;  %v883_v54 = vrot.slane %v2963_v44, 4 }
 0x215   : > { %v2968_v22 = vpop.permute.xlu1 %1015  ;;  %1663 = vmatpush1.bf16.msra.mxu0 %v2276_v10  ;;  %v2970_v33 = vpop.permute.xlu0 %917 }
 0x216   : > { %2292 = vmatprep.subr.msk.bf16.mxu0 %vm665_vm0, %v2285_v17  ;;  %v924_v35 = vrot.slane %v2970_v33, 4 }
 0x219   : > { %v2974_v23 = vpop.permute.xlu1 %1125  ;;  %1665 = vmatpush1.bf16.msra.mxu0 %v1633_v31  ;;  %v2976_v37 = vpop.permute.xlu0 %1127 }
 0x21a   : > { %v1133_v57 = vrot.slane %v2974_v23, 4 }
 0x21c   : > { %2293 = vmatmul.mubr.msk.bf16.vlgmr.msra.gmra.mrb[8].mxu0 %vm1627_vm4, %v2981_v38 }
 0x21d   : > { %v874_v53 = vpop.permute.xlu1 %873  ;;  %v2986_v15 = vpop.permute.xlu0 %1083  ;;  %1770 = vmatprep.mubr.bf16.mxu0 %v2353_v2 }
 0x21e   : > { %v881_v39 = vrot.slane %v874_v53, 4  ;;  %v1091_v40 = vrot.slane %v2986_v15, 4 }
 0x220   : > { %v887_v19 = vsel %vm665_vm0, %v880_v18, %v881_v39  ;;  %v1097_v61 = vsel %vm665_vm0, %v1090_v51, %v1091_v40  ;;  %v1138_v51 = vsel %vm665_vm0, %v1132_v45, %v1133_v57 }
 0x221   : > { %v3002_v0 = vpop.permute.xlu1 %1011  ;;  %v3004_v1 = vpop.permute.xlu0 %1195  ;;  %v888_v12 = vsel %vm885_vm12, %v2904_v28, %v887_v19  ;;  %v1098_v45 = vsel %vm1095_vm9, %v2919_v41, %v1097_v61  ;;  %v1139_v36 = vsel %vm663_vm14, %v2899_v34, %v1138_v51  ;;  %v925_v34 = vrot.slane %v2951_v8, 4 }
 0x222   : > { %v1019_v5 = vrot.slane %v3002_v0, 4  ;;  %v1203_v18 = vrot.slane %v3004_v1, 4  ;;  %v2254_v32 = vcombine.low %v888_v12, %v930_v56  ;;  %v2255_v24 = vcombine.high %v888_v12, %v930_v56 }
 0x224   : > { %v1025_v28 = vsel %vm665_vm0, %v1018_v29, %v1019_v5  ;;  %v1208_v30 = vsel %vm665_vm0, %v1202_v62, %v1203_v18  ;;  %1697 = vmatprep.subr.bf16.mxu1 %v2255_v24  ;;  %v1314_v29 = vrot.slane %v2965_v20, 4 }
 0x225   : > { %v3025_v25 = vpop.permute.xlu1 %1087  ;;  %1698 = vmatpush1.bf16.msra.mxu1 %v2254_v32  ;;  %v3027_v4 = vpop.permute.xlu0 %1308  ;;  %v1026_v50 = vsel %vm1023_vm7, %v2913_v43, %v1025_v28  ;;  %v1209_v48 = vsel %vm1056_vm3, %v2939_v60, %v1208_v30  ;;  %v931_v60 = vsel %vm665_vm0, %v923_v46, %v924_v35  ;;  %v1134_v32 = vrot.slane %v2976_v37, 4 }
 0x226   : > { %v2262_v62 = vcombine.low %v1026_v50, %v1098_v45  ;;  %v2263_v11 = vcombine.high %v1026_v50, %v1098_v45  ;;  %v2271_v21 = vcombine.high %v1139_v36, %v1209_v48  ;;  %v1320_v41 = vsel %vm665_vm0, %v1313_v59, %v1314_v29 }
 0x227   : > { %v2270_v31 = vcombine.low %v1139_v36, %v1209_v48  ;;  %v1321_v8 = vsel %vm1318_vm15, %v2902_v58, %v1320_v41  ;;  %v932_v56 = vsel %vm927_vm2, %v2953_v16, %v931_v60  ;;  %v1093_v16 = vrot.slane %v3025_v25, 4 }
 0x228   : > { %1699 = vmatprep.subr.bf16.mxu1 %v2263_v11  ;;  %v1140_v25 = vsel %vm665_vm0, %v1133_v57, %v1134_v32 }
 0x229   : > { %v3039_v10 = vpop.permute.xlu1 %1265  ;;  %1700 = vmatpush1.bf16.msra.mxu1 %v2262_v62  ;;  %v876_v43 = vpop.permute.xlu0 %875 }
 0x22a   : > { %v1273_v17 = vrot.slane %v3039_v10, 4  ;;  %v882_v13 = vrot.slane %v876_v43, 4  ;;  %1701 = vmatprep.subr.bf16.mxu1 %v2271_v21  ;;  %v1021_v21 = vrot.slane %v2968_v22, 4 }
 0x22c   : > { %v1278_v19 = vsel %vm665_vm0, %v1272_v52, %v1273_v17  ;;  %v889_v61 = vsel %vm665_vm0, %v881_v39, %v882_v13  ;;  %v891_v52 = vsel %vm665_vm0, %v882_v13, %v883_v54 }
 0x22d   : > { %v3056_v59 = vpop.permute.xlu1 %1377  ;;  %1702 = vmatpush1.bf16.msra.mxu1 %v2270_v31  ;;  %v1014_v46 = vpop.permute.xlu0 %1013  ;;  %v1279_v12 = vsel %vm984_vm5, %v2921_v49, %v1278_v19  ;;  %v890_v44 = vsel %vm885_vm12, %v874_v53, %v889_v61  ;;  %v933_v49 = vsel %vm665_vm0, %v924_v35, %v925_v34  ;;  %v892_v62 = vsel %vm885_vm12, %v876_v43, %v891_v52 }
 0x22e   : > { %v1385_v39 = vrot.slane %v3056_v59, 4  ;;  %v1020_v24 = vrot.slane %v1014_v46, 4  ;;  %v2278_v51 = vcombine.low %v1279_v12, %v1321_v8  ;;  %v2279_v28 = vcombine.high %v1279_v12, %v1321_v8 }
 0x22f   : > { %v2256_v30 = vcombine.low %v890_v44, %v932_v56  ;;  %v2257_v50 = vcombine.high %v890_v44, %v932_v56  ;;  %v1315_v43 = vrot.slane %v3027_v4, 4  ;;  %v1141_v44 = vsel %vm663_vm14, %v2974_v23, %v1140_v25 }
 0x230   : > { %v1390_v58 = vsel %vm665_vm0, %v1384_v63, %v1385_v39  ;;  %1703 = vmatprep.subr.bf16.mxu1 %v2279_v28  ;;  %v934_v63 = vsel %vm927_vm2, %v2970_v33, %v933_v49  ;;  %v1029_v13 = vsel %vm665_vm0, %v1020_v24, %v1021_v21 }
 0x231   : > { %1738 = vmatprep.subr.bf16.mxu0 %v2257_v50  ;;  %v1130_v53 = vpop.permute.xlu1 %1129  ;;  %v1086_v45 = vpop.permute.xlu0 %1085  ;;  %v1391_v48 = vsel %vm846_vm1, %v2941_v55, %v1390_v58  ;;  %1704 = vmatpush1.bf16.msra.mxu1 %v2278_v51  ;;  %v1027_v55 = vsel %vm665_vm0, %v1019_v5, %v1020_v24  ;;  %v2259_v33 = vcombine.high %v892_v62, %v934_v63 }
 0x232   : > { %1739 = vmatpush1.bf16.msra.mxu0 %v2256_v30  ;;  %v1092_v35 = vrot.slane %v1086_v45, 4  ;;  %v2287_v11 = vcombine.high %v1391_v48, %v1391_v48  ;;  %v2286_v36 = vcombine.low %v1391_v48, %v1391_v48  ;;  %v1135_v57 = vrot.slane %v1130_v53, 4 }
 0x233   : > { %v1028_v61 = vsel %vm1023_vm7, %v3002_v0, %v1027_v55  ;;  %v2258_v56 = vcombine.low %v892_v62, %v934_v63  ;;  %v1030_v52 = vsel %vm1023_vm7, %v1014_v46, %v1029_v13  ;;  %v1322_v46 = vsel %vm665_vm0, %v1314_v29, %v1315_v43 }
 0x234   : > { %v1099_v41 = vsel %vm665_vm0, %v1091_v40, %v1092_v35  ;;  %v1101_v60 = vsel %vm665_vm0, %v1092_v35, %v1093_v16  ;;  %2294 = vmatprep.subr.msk.bf16.mxu1 %vm665_vm0, %v2287_v11  ;;  %v1639_v22 = vsel %vm665_vm0, %v2286_v36, 0  ;;  %v1142_v51 = vsel %vm665_vm0, %v1134_v32, %v1135_v57 }
 0x235   : > { %v1200_v31 = vpop.permute.xlu1 %1199  ;;  %v1198_v34 = vpop.permute.xlu0 %1197  ;;  %v1100_v5 = vsel %vm1095_vm9, %v2986_v15, %v1099_v41  ;;  %v1102_v54 = vsel %vm1095_vm9, %v1086_v45, %v1101_v60  ;;  %1706 = vmatpush1.bf16.msra.mxu1 %v1639_v22  ;;  %v1143_v53 = vsel %vm663_vm14, %v2976_v37, %v1142_v51  ;;  %v1323_v11 = vsel %vm1318_vm15, %v2965_v20, %v1322_v46 }
 0x236   : > { %v1205_v19 = vrot.slane %v1200_v31, 4  ;;  %v1204_v40 = vrot.slane %v1198_v34, 4  ;;  %1779 = vmatprep.subr.bf16.mxu1 %v2259_v33  ;;  %v2264_v12 = vcombine.low %v1028_v61, %v1100_v5  ;;  %v2265_v8 = vcombine.high %v1028_v61, %v1100_v5 }
 0x237   : > { %v2267_v28 = vcombine.high %v1030_v52, %v1102_v54  ;;  %v2266_v16 = vcombine.low %v1030_v52, %v1102_v54  ;;  %v1865_v54 = vld [vmem:[#allocation4] sm:$0x1]  ;;  %vm1875_vm14 = vcmask 64512  }
 0x238   : > { %v1210_v15 = vsel %vm665_vm0, %v1203_v18, %v1204_v40  ;;  %v1212_v24 = vsel %vm665_vm0, %v1204_v40, %v1205_v19  ;;  %2295 = vmatmul.mubr.msk.bf16.vlgmr.msra.gmra.mrb[8].mxu1 %vm1627_vm4, %v2981_v38  ;;  %1740 = vmatprep.subr.bf16.mxu0 %v2265_v8 }
 0x239   : > { %v1270_v0 = vpop.permute.xlu1 %1269  ;;  %v1268_v30 = vpop.permute.xlu0 %1267  ;;  %v1211_v23 = vsel %vm1056_vm3, %v3004_v1, %v1210_v15  ;;  %v1213_v18 = vsel %vm1056_vm3, %v1198_v34, %v1212_v24  ;;  %1741 = vmatpush1.bf16.msra.mxu0 %v2264_v12  ;;  %1780 = vmatpush1.bf16.msra.mxu1 %v2258_v56 }
 0x23a   : > { %v1275_v50 = vrot.slane %v1270_v0, 4  ;;  %v1274_v32 = vrot.slane %v1268_v30, 4  ;;  %1781 = vmatprep.subr.bf16.mxu1 %v2267_v28  ;;  %v2272_v49 = vcombine.low %v1141_v44, %v1211_v23  ;;  %v2273_v58 = vcombine.high %v1141_v44, %v1211_v23  ;;  %1811 = vmatprep.mubr.bf16.mxu1 %v2353_v2  ;;  %v1864_v0 = vld [vmem:[%s3212_s5] sm:$0x1] }
 0x23b   : > { %v2275_v29 = vcombine.high %v1143_v53, %v1213_v18  ;;  %1868 = vperm.xlu1 %2344, %v1865_v54  }
 0x23c   : > { %v1280_v1 = vsel %vm665_vm0, %v1273_v17, %v1274_v32  ;;  %v1282_v45 = vsel %vm665_vm0, %v1274_v32, %v1275_v50  ;;  %1742 = vmatprep.subr.bf16.mxu0 %v2273_v58  ;;  %v2274_v17 = vcombine.low %v1143_v53, %v1213_v18 }
 0x23d   : > { %v1311_v48 = vpop.permute.xlu1 %1310  ;;  %v1380_v62 = vpop.permute.xlu0 %1379  ;;  %v1281_v35 = vsel %vm984_vm5, %v3039_v10, %v1280_v1  ;;  %1743 = vmatpush1.bf16.msra.mxu0 %v2272_v49  ;;  %1782 = vmatpush1.bf16.msra.mxu1 %v2266_v16  ;;  %v1283_v10 = vsel %vm984_vm5, %v1268_v30, %v1282_v45 }
 0x23e   : > { %v1316_v36 = vrot.slane %v1311_v48, 4  ;;  %v1386_v37 = vrot.slane %v1380_v62, 4  ;;  %v2280_v21 = vcombine.low %v1281_v35, %v1323_v11  ;;  %v2281_v63 = vcombine.high %v1281_v35, %v1323_v11  ;;  %1783 = vmatprep.subr.bf16.mxu1 %v2275_v29 }
 0x240   : > { %v1324_v25 = vsel %vm665_vm0, %v1315_v43, %v1316_v36  ;;  %v1392_v55 = vsel %vm665_vm0, %v1385_v39, %v1386_v37  ;;  %1744 = vmatprep.subr.bf16.mxu0 %v2281_v63 }
 0x241   : > { %v1382_v41 = vpop.permute.xlu1 %1381  ;;  %v1393_v20 = vsel %vm846_vm1, %v3056_v59, %v1392_v55  ;;  %v1325_v60 = vsel %vm1318_vm15, %v3027_v4, %v1324_v25  ;;  %1745 = vmatpush1.bf16.msra.mxu0 %v2280_v21  ;;  %1784 = vmatpush1.bf16.msra.mxu1 %v2274_v17 }
 0x242   : > { %v1387_v22 = vrot.slane %v1382_v41, 4  ;;  %v2289_v33 = vcombine.high %v1393_v20, %v1393_v20  ;;  %v2282_v13 = vcombine.low %v1283_v10, %v1325_v60  ;;  %v2283_v43 = vcombine.high %v1283_v10, %v1325_v60 }
 0x243   : > { %v2288_v57 = vcombine.low %v1393_v20, %v1393_v20 }
 0x244   : > { %v1394_v31 = vsel %vm665_vm0, %v1386_v37, %v1387_v22  ;;  %2296 = vmatprep.subr.msk.bf16.mxu0 %vm665_vm0, %v2289_v33  ;;  %1785 = vmatprep.subr.bf16.mxu1 %v2283_v43 }
 0x245   : > { %v1395_v39 = vsel %vm846_vm1, %v1380_v62, %v1394_v31  ;;  %v1645_v34 = vsel %vm665_vm0, %v2288_v57, 0  ;;  %1786 = vmatpush1.bf16.msra.mxu1 %v2282_v13 }
 0x246   : > { %1747 = vmatpush1.bf16.msra.mxu0 %v1645_v34  ;;  %v2291_v4 = vcombine.high %v1395_v39, %v1395_v39  ;;  %v2290_v59 = vcombine.low %v1395_v39, %v1395_v39 }
 0x248   : > { %2298 = vmatprep.subr.msk.bf16.mxu1 %vm665_vm0, %v2291_v4  ;;  %v1651_v5 = vsel %vm665_vm0, %v2290_v59, 0 }
 0x249   : > { %2297 = vmatmul.mubr.msk.bf16.vlgmr.msra.gmra.mrb[12].mxu0 %vm1627_vm4, %v2981_v38  ;;  %1788 = vmatpush1.bf16.msra.mxu1 %v1651_v5 }
 0x24a   : > { %1935 = vmatprep.mubr.bf16.mxu0 %v2353_v2 }
 0x24c   : > { %2299 = vmatmul.mubr.msk.bf16.vlgmr.msra.gmra.mrb[12].mxu1 %vm1627_vm4, %v2981_v38 }
 0x24d   : > { %1976 = vmatprep.mubr.bf16.mxu1 %v2353_v2 }
 0x24e   : > { %v1445_v19 = vpop.permute.xlu0 %1444 }
 0x2ef   : > { %v1690_v40 = vpop.f32.mrb[8].mxu0 }
 0x2f0   : > { %v1691_v61 = vadd.f32 %v1690_v40, %v1445_v19  ;;  %v1692_v12 = vpop.f32.mrb[9].mxu0 }
 0x2f1   : > { %v1693_v8 = vadd.f32 %v1692_v12, %v1445_v19  ;;  %v1694_v44 = vpop.f32.mrb[10].mxu0  ;;  %v1872_v12 = vshrl.u32 %v684_v3, 7 }
 0x2f2   : > { %v1820_v56 = vmax.f32 %v1691_v61, 0.0  ;;  %v1695_v52 = vpop.f32.mrb[11].mxu0  ;;  %v1869_v44 = vpop.permute.xlu1 %1868 }
 0x2f3   : > { %v1821_v15 = vmax.f32 %v1693_v8, 0.0  ;;  %v1873_v8 = vsub.s32 0, %v1872_v12 }
 0x2f4   : > { %v1828_v24 = vpack.c.bf16 %v1820_v56, %v1820_v56 }
 0x2f5   : > { %v1829_v38 = vpack.c.bf16 %v1821_v15, %v1821_v15  ;;  %v2320_v51 = vpack.c.bf16 %v1821_v15, %v1820_v56  ;;  %v1874_v56 = vrot.slane %v1869_v44, %v1873_v8 }
 0x2f6   : > { %v1880_v28 = vsel %vm665_vm0, %v1828_v24, 0 }
 0x2f7   : > { %1860 = vst [vmem:[%s3152_s11] sm:$0xff] %v2320_v51  ;;  %2304 = vmatprep.subr.msk.bf16.mxu0 %vm665_vm0, %v1829_v38 }
 0x2f8   : > { %1904 = vmatpush1.bf16.msra.mxu0 %v1880_v28 }
 0x2fb   : > { %2305 = vmatmul.mubr.msk.bf16.vlgmr.msra.gmra.mrb[16].mxu0 %vm1875_vm14, %v1864_v0 }
 0x2fc   : > { %2017 = vmatprep.mubr.bf16.mxu0 %v2353_v2 }
 0x30b   : > { %v1731_v30 = vpop.f32.mrb[8].mxu1 }
 0x30c   : > { %v1732_v23 = vadd.f32 %v1731_v30, %v1445_v19  ;;  %v1733_v46 = vpop.f32.mrb[9].mxu1 }
 0x30d   : > { %v1734_v18 = vadd.f32 %v1733_v46, %v1445_v19  ;;  %v1735_v50 = vpop.f32.mrb[10].mxu1 }
 0x30e   : > { %v1822_v32 = vmax.f32 %v1732_v23, 0.0  ;;  %v1736_v49 = vpop.f32.mrb[11].mxu1 }
 0x30f   : > { %v1823_v58 = vmax.f32 %v1734_v18, 0.0 }
 0x310   : > { %v1830_v16 = vpack.c.bf16 %v1822_v32, %v1822_v32 }
 0x311   : > { %v1831_v53 = vpack.c.bf16 %v1823_v58, %v1823_v58  ;;  %v2321_v1 = vpack.c.bf16 %v1823_v58, %v1822_v32 }
 0x312   : > { %v1886_v29 = vsel %vm665_vm0, %v1830_v16, 0 }
 0x313   : > { %1861 = vst [vmem:[%s3152_s11 + $0x8] sm:$0xff] %v2321_v1  ;;  %2306 = vmatprep.subr.msk.bf16.mxu1 %vm665_vm0, %v1831_v53 }
 0x314   : > { %1945 = vmatpush1.bf16.msra.mxu1 %v1886_v29 }
 0x317   : > { %2307 = vmatmul.mubr.msk.bf16.vlgmr.msra.gmra.mrb[16].mxu1 %vm1875_vm14, %v1864_v0 }
 0x318   : > { %2058 = vmatprep.mubr.bf16.mxu1 %v2353_v2 }
 0x31c   : > { %v1772_v45 = vpop.f32.mrb[12].mxu0 }
 0x31d   : > { %v1773_v48 = vadd.f32 %v1772_v45, %v1445_v19  ;;  %v1774_v62 = vpop.f32.mrb[13].mxu0 }
 0x31e   : > { %v1775_v35 = vadd.f32 %v1774_v62, %v1445_v19  ;;  %v1776_v11 = vpop.f32.mrb[14].mxu0 }
 0x31f   : > { %v1824_v36 = vmax.f32 %v1773_v48, 0.0  ;;  %v1777_v37 = vpop.f32.mrb[15].mxu0  ;;  %v1813_v63 = vpop.f32.mrb[12].mxu1 }
 0x320   : > { %v1825_v21 = vmax.f32 %v1775_v35, 0.0  ;;  %v1814_v25 = vadd.f32 %v1813_v63, %v1445_v19  ;;  %v1815_v55 = vpop.f32.mrb[13].mxu1 }
 0x321   : > { %v1832_v17 = vpack.c.bf16 %v1824_v36, %v1824_v36  ;;  %v1816_v20 = vadd.f32 %v1815_v55, %v1445_v19  ;;  %v1817_v60 = vpop.f32.mrb[14].mxu1 }
 0x322   : > { %v1833_v10 = vpack.c.bf16 %v1825_v21, %v1825_v21  ;;  %v2322_v41 = vpack.c.bf16 %v1825_v21, %v1824_v36  ;;  %v1826_v22 = vmax.f32 %v1814_v25, 0.0  ;;  %v1818_v2 = vpop.f32.mrb[15].mxu1 }
 0x323   : > { %v1892_v33 = vsel %vm665_vm0, %v1832_v17, 0  ;;  %v1827_v13 = vmax.f32 %v1816_v20, 0.0 }
 0x324   : > { %1862 = vst [vmem:[%s3152_s11 + $0x10] sm:$0xff] %v2322_v41  ;;  %2308 = vmatprep.subr.msk.bf16.mxu0 %vm665_vm0, %v1833_v10  ;;  %v1834_v43 = vpack.c.bf16 %v1826_v22, %v1826_v22 }
 0x325   : > { %1986 = vmatpush1.bf16.msra.mxu0 %v1892_v33  ;;  %v1835_v57 = vpack.c.bf16 %v1827_v13, %v1827_v13  ;;  %v2323_v31 = vpack.c.bf16 %v1827_v13, %v1826_v22 }
 0x326   : > { %v1898_v39 = vsel %vm665_vm0, %v1834_v43, 0 }
 0x327   : > { %1863 = vst [vmem:[%s3152_s11 + $0x18] sm:$0xff] %v2323_v31  ;;  %2310 = vmatprep.subr.msk.bf16.mxu1 %vm665_vm0, %v1835_v57  ;;  %vm2067_vm0 = vcmask 1040384  }
 0x328   : > { %2309 = vmatmul.mubr.msk.bf16.vlgmr.msra.gmra.mrb[20].mxu0 %vm1875_vm14, %v1864_v0  ;;  %2027 = vmatpush1.bf16.msra.mxu1 %v1898_v39 }
 0x32b   : > { %2311 = vmatmul.mubr.msk.bf16.vlgmr.msra.gmra.mrb[20].mxu1 %vm1875_vm14, %v1864_v0 }
 0x3ce   : > { %v1937_v34 = vpop.f32.mrb[16].mxu0 }
 0x3cf   : > { %v1939_v4 = vpop.f32.mrb[17].mxu0  ;;  %v1938_v38 = vadd.f32 %v1937_v34, %v1874_v56 }
 0x3d0   : > { %v1941_v59 = vpop.f32.mrb[18].mxu0  ;;  %v1940_v51 = vadd.f32 %v1939_v4, %v1874_v56 }
 0x3d1   : > { %v1942_v5 = vpop.f32.mrb[19].mxu0  ;;  %v2068_v58 = vsel %vm2067_vm0, %v1938_v38, -inf }
 0x3d2   : > { %v2069_v16 = vsel %vm2067_vm0, %v1940_v51, -inf }
 0x3ea   : > { %v1978_v54 = vpop.f32.mrb[16].mxu1 }
 0x3eb   : > { %v1980_v19 = vpop.f32.mrb[17].mxu1  ;;  %v1979_v30 = vadd.f32 %v1978_v54, %v1874_v56 }
 0x3ec   : > { %v1982_v40 = vpop.f32.mrb[18].mxu1  ;;  %v1981_v46 = vadd.f32 %v1980_v19, %v1874_v56 }
 0x3ed   : > { %v1983_v61 = vpop.f32.mrb[19].mxu1  ;;  %v2070_v48 = vsel %vm2067_vm0, %v1979_v30, -inf }
 0x3ee   : > { %v2071_v11 = vsel %vm2067_vm0, %v1981_v46, -inf }
 0x3fb   : > { %v2019_v52 = vpop.f32.mrb[20].mxu0 }
 0x3fc   : > { %v2020_v15 = vadd.f32 %v2019_v52, %v1874_v56  ;;  %v2021_v24 = vpop.f32.mrb[21].mxu0 }
 0x3fd   : > { %v2022_v28 = vadd.f32 %v2021_v24, %v1874_v56  ;;  %v2023_v0 = vpop.f32.mrb[22].mxu0 }
 0x3fe   : > { %v2024_v23 = vpop.f32.mrb[23].mxu0  ;;  %v2072_v18 = vsel %vm2067_vm0, %v2020_v15, -inf  ;;  %v2060_v32 = vpop.f32.mrb[20].mxu1 }
 0x3ff   : > { %v2074_v50 = vsel %vm2067_vm0, %v2022_v28, -inf  ;;  %v2061_v3 = vadd.f32 %v2060_v32, %v1874_v56  ;;  %v2062_v49 = vpop.f32.mrb[21].mxu1  ;;  %v2073_v29 = vmax.f32 %v2068_v58, %v2072_v18 }
 0x400   : > { %v2063_v53 = vadd.f32 %v2062_v49, %v1874_v56  ;;  %v2064_v1 = vpop.f32.mrb[22].mxu1  ;;  %v2075_v45 = vmax.f32 %v2069_v16, %v2074_v50 }
 0x401   : > { %v2076_v62 = vsel %vm2067_vm0, %v2061_v3, -inf  ;;  %v2065_v35 = vpop.f32.mrb[23].mxu1 }
 0x402   : > { %v2077_v36 = vmax.f32 %v2070_v48, %v2076_v62  ;;  %v2078_v37 = vsel %vm2067_vm0, %v2063_v53, -inf  ;;  %v2080_v63 = vmax.f32 %v2073_v29, %v2075_v45 }
 0x403   : > { %v2079_v21 = vmax.f32 %v2071_v11, %v2078_v37 }
 0x405   : > { %v2081_v17 = vmax.f32 %v2077_v36, %v2079_v21 }
 0x407   : > { %v2082_v25 = vmax.f32 %v2080_v63, %v2081_v17 }
 0x409   : > { %2083 = vmax.xlane.f32.xlu0 %v2082_v25 }
 0x496   : > { %v2084_v55 = vpop.xlane.xlu0 %2083 }
 0x497   : > { %vm2085_vm1 = vcmp.ge.f32.partialorder %v1938_v38, %v2084_v55  ;;  %vm2086_vm3 = vcmp.ge.f32.partialorder %v1940_v51, %v2084_v55  ;;  %vm2087_vm5 = vcmp.ge.f32.partialorder %v1979_v30, %v2084_v55  ;;  %vm2088_vm7 = vcmp.ge.f32.partialorder %v1981_v46, %v2084_v55 }
 0x498   : > { %vm2089_vm9 = vcmp.ge.f32.partialorder %v2020_v15, %v2084_v55  ;;  %vm2090_vm12 = vcmp.ge.f32.partialorder %v2022_v28, %v2084_v55  ;;  %vm2091_vm6 = vcmp.ge.f32.partialorder %v2061_v3, %v2084_v55  ;;  %vm2092_vm8 = vcmp.ge.f32.partialorder %v2063_v53, %v2084_v55 }
 0x499   : > { %v2093_v10 = vsel %vm2085_vm1, %v2430_v6, 1024  ;;  %v2094_v41 = vsel %vm2086_vm3, %v2439_v7, 1024  ;;  %v2095_v20 = vsel %vm2087_vm5, %v2443_v9, 1024  ;;  %v2096_v60 = vsel %vm2088_vm7, %v2451_v14, 1024 }
 0x49a   : > { %v2097_v22 = vsel %vm2089_vm9, %v2481_v42, 1024  ;;  %v2098_v2 = vsel %vm2090_vm12, %v2491_v47, 1024  ;;  %v2099_v33 = vsel %vm2091_vm6, %v2594_v26, 1024  ;;  %v2100_v13 = vsel %vm2092_vm8, %v2597_v27, 1024 }
 0x49b   : > { %v2101_v43 = vsel %vm2067_vm0, %v2093_v10, 2147483647  ;;  %v2102_v57 = vsel %vm2067_vm0, %v2094_v41, 2147483647  ;;  %v2103_v6 = vsel %vm2067_vm0, %v2095_v20, 2147483647 }
 0x49c   : > { %v2104_v7 = vsel %vm2067_vm0, %v2096_v60, 2147483647  ;;  %v2105_v9 = vsel %vm2067_vm0, %v2097_v22, 2147483647  ;;  %v2108_v14 = vsel %vm2067_vm0, %v2098_v2, 2147483647 }
 0x49d   : > { %vm2106_vm10 = vcmp.lt.s32.totalorder %v2101_v43, %v2105_v9  ;;  %vm2109_vm11 = vcmp.lt.s32.totalorder %v2102_v57, %v2108_v14  ;;  %v2111_v42 = vsel %vm2067_vm0, %v2099_v33, 2147483647  ;;  %v2114_v47 = vsel %vm2067_vm0, %v2100_v13, 2147483647 }
 0x49e   : > { %v2107_v26 = vsel %vm2106_vm10, %v2101_v43, %v2105_v9  ;;  %v2110_v27 = vsel %vm2109_vm11, %v2102_v57, %v2108_v14  ;;  %vm2112_vm13 = vcmp.lt.s32.totalorder %v2103_v6, %v2111_v42  ;;  %vm2115_vm2 = vcmp.lt.s32.totalorder %v2104_v7, %v2114_v47 }
 0x49f   : > { %v2113_v31 = vsel %vm2112_vm13, %v2103_v6, %v2111_v42  ;;  %v2116_v39 = vsel %vm2115_vm2, %v2104_v7, %v2114_v47  ;;  %vm2117_vm15 = vcmp.lt.s32.totalorder %v2107_v26, %v2110_v27  ;;  %vm2137_vm1 = vcmask 0  }
 0x4a0   : > { %v2118_v34 = vsel %vm2117_vm15, %v2107_v26, %v2110_v27  ;;  %vm2119_vm4 = vcmp.lt.s32.totalorder %v2113_v31, %v2116_v39 }
 0x4a1   : > { %v2120_v4 = vsel %vm2119_vm4, %v2113_v31, %v2116_v39 }
 0x4a2   : > { %vm2121_vm14 = vcmp.lt.s32.totalorder %v2118_v34, %v2120_v4 }
 0x4a3   : > { %v2122_v59 = vsel %vm2121_vm14, %v2118_v34, %v2120_v4 }
 0x4a4   : > { %v2124_v5 = vshra.s32 %v2122_v59, 16  ;;  %v2123_v19 = vand.u32 65535, %v2122_v59 }
 0x4a6   : > { %v2126_v54 = vcvt.s32.f32 %v2124_v5  ;;  %v2125_v61 = vcvt.s32.f32 %v2123_v19 }
 0x4a8   : > { %2127 = vmin.xlane.f32.xlu1 %v2126_v54 }
 0x535   : > { %v2128_v40 = vpop.xlane.xlu1 %2127 }
 0x536   : > { %vm2129_vm0 = vcmp.eq.f32.partialorder %v2126_v54, %v2128_v40  ;;  %v2134_v8 = vcvt.f32.s32 %v2128_v40 }
 0x537   : > { %v2130_v12 = vsel %vm2129_vm0, %v2125_v61, inf }
 0x538   : > { %2131 = vmin.xlane.f32.xlu0 %v2130_v12  ;;  %v2135_v56 = vshll.u32 %v2134_v8, 16 }
 0x5c5   : > { %v2132_v44 = vpop.xlane.xlu0 %2131 }
 0x5c6   : > { %v2133_v52 = vcvt.f32.s32 %v2132_v44 }
 0x5c8   : > { %v2136_v15 = vadd.s32 %v2135_v56, %v2133_v52 }
 0x5ca   : > { %2138 = vst.msk [vmem:[%s316_s16] sm:$0x1] %vm2137_vm1, %v2136_v15 }
 0x5cb PF: > { %s21_s29 = sadd.s32 1, %s2351_s29  }
 0x5cc   : > { %p18_p4 = scmp.ge.s32.totalorder %s21_s29, 4  }
 0x5ce   :  { %20 = sbr.rel (!%p18_p4) target bundleno = 3 (0x3), region = 90 }

// kernel: rcnn_forward.3
= control target key start
LH: loop header
LB: loop body
LE: loop exit
PB: predicated region body
PF: predicated region fallthrough
CT: control target
= control target key end

     0   :  { %v853_v22 = vmov 1966171168   ;;  %v111_v24 = vlaneseq  ;;  %v854_v41 = vmov 0.0   ;;  %vm855_vm0 = vmmov 0   ;;  %s1079_s1 = inlined_call_operand.vmem [shape: bf16[512,128], index: 1, kind: input, shape index: {}]   ;;  %s1080_s0 = inlined_call_operand.vmem [shape: bf16[2,512], index: 0, kind: input, shape index: {}]   ;;  %s1081_s3 = inlined_call_operand.vmem [shape: bf16[128,128], index: 3, kind: input, shape index: {}]   ;;  %s1082_s5 = inlined_call_operand.vmem [shape: bf16[128,128], index: 5, kind: input, shape index: {}]   ;;  %s1083_s2 = inlined_call_operand.vmem [shape: f32[1,128], index: 2, kind: input, shape index: {}]   ;;  %s1084_s4 = inlined_call_operand.vmem [shape: f32[1,128], index: 4, kind: input, shape index: {}]   ;;  %s1085_s6 = inlined_call_operand.vmem [shape: f32[1,128], index: 6, kind: input, shape index: {}]   ;;  %s1086_s7 = inlined_call_operand.vmem [shape: f32[2,128], index: 7, kind: output, shape index: {}]  }
   0x1   :  { %v801_v0 = vld [vmem:[%s1079_s1 + $0x40] sm:$0xff]   ;;  %v805_v4 = vld [vmem:[%s1079_s1 + $0x48] sm:$0xff]   ;;  %v809_v8 = vld [vmem:[%s1079_s1 + $0x50] sm:$0xff]   ;;  %v109_v23 = vunpack.c.l.s4 %v853_v22  ;;  %vm626_vm1 = vcmask 9216  }
   0x2   :  { %v802_v1 = vld [vmem:[%s1079_s1 + $0xc0] sm:$0xff]   ;;  %696 = vmatprep.subr.bf16.mxu0 %v801_v0  ;;  %v806_v5 = vld [vmem:[%s1079_s1 + $0xc8] sm:$0xff]   ;;  %v810_v9 = vld [vmem:[%s1079_s1 + $0xd0] sm:$0xff]   ;;  %v112_v30 = vshrl.u32 %v111_v24, 7 }
   0x3   :  { %v803_v2 = vld [vmem:[%s1079_s1] sm:$0xff]   ;;  %718 = vmatprep.subr.bf16.mxu1 %v802_v1  ;;  %v807_v6 = vld [vmem:[%s1079_s1 + $0x8] sm:$0xff]   ;;  %v811_v10 = vld [vmem:[%s1079_s1 + $0x10] sm:$0xff]   ;;  %v110_v29 = vunpack.c.0.s8 %v109_v23 }
   0x4   :  { %v804_v3 = vld [vmem:[%s1079_s1 + $0x80] sm:$0xff]   ;;  %697 = vmatpush3.bf16.msra.mxu0 %v803_v2  ;;  %v808_v7 = vld [vmem:[%s1079_s1 + $0x88] sm:$0xff]   ;;  %v812_v11 = vld [vmem:[%s1079_s1 + $0x90] sm:$0xff]  }
   0x5   :  { %719 = vmatpush3.bf16.msra.mxu1 %v804_v3  ;;  %698 = vmatprep.subr.bf16.mxu0 %v805_v4  ;;  %v813_v12 = vld [vmem:[%s1079_s1 + $0x58] sm:$0xff]   ;;  %v817_v16 = vld [vmem:[%s1079_s1 + $0x60] sm:$0xff]   ;;  %v821_v20 = vld [vmem:[%s1079_s1 + $0x68] sm:$0xff]   ;;  %v113_v35 = vsub.s32 %v110_v29, %v112_v30 }
   0x6   :  { %720 = vmatprep.subr.bf16.mxu1 %v806_v5  ;;  %v814_v13 = vld [vmem:[%s1079_s1 + $0xd8] sm:$0xff]   ;;  %v818_v17 = vld [vmem:[%s1079_s1 + $0xe0] sm:$0xff]   ;;  %v822_v21 = vld [vmem:[%s1079_s1 + $0xe8] sm:$0xff]  }
   0x7   :  { %v815_v14 = vld [vmem:[%s1079_s1 + $0x18] sm:$0xff]   ;;  %v819_v18 = vld [vmem:[%s1079_s1 + $0x20] sm:$0xff]   ;;  %v823_v25 = vld [vmem:[%s1079_s1 + $0x28] sm:$0xff]  }
   0x8   :  { %699 = vmatpush3.bf16.msra.mxu0 %v807_v6  ;;  %v816_v15 = vld [vmem:[%s1079_s1 + $0x98] sm:$0xff]   ;;  %v820_v19 = vld [vmem:[%s1079_s1 + $0xa0] sm:$0xff]   ;;  %v824_v26 = vld [vmem:[%s1079_s1 + $0xa8] sm:$0xff]  }
   0x9   :  { %721 = vmatpush3.bf16.msra.mxu1 %v808_v7  ;;  %700 = vmatprep.subr.bf16.mxu0 %v809_v8  ;;  %v825_v27 = vld [vmem:[%s1079_s1 + $0x70] sm:$0xff]   ;;  %v829_v33 = vld [vmem:[%s1079_s1 + $0x78] sm:$0xff]   ;;  %v645_v38 = vld.sshfl [vmem:[%s1080_s0] sm:$0x33 pattern:$0x75316420] }
   0xa   :  { %722 = vmatprep.subr.bf16.mxu1 %v810_v9  ;;  %v826_v28 = vld [vmem:[%s1079_s1 + $0xf0] sm:$0xff]   ;;  %v830_v34 = vld [vmem:[%s1079_s1 + $0xf8] sm:$0xff]   ;;  %v107_v39 = vcombine.high %v645_v38, %v645_v38  ;;  %v114_v40 = vrot.slane %v645_v38, %v113_v35  ;;  %v833_v43 = vld [vmem:[%s1081_s3] sm:$0xff]  }
   0xb   :  { %v827_v31 = vld [vmem:[%s1079_s1 + $0x30] sm:$0xff]   ;;  %v831_v36 = vld [vmem:[%s1079_s1 + $0x38] sm:$0xff]   ;;  %v834_v46 = vld [vmem:[%s1081_s3 + $0x8] sm:$0xff]  }
   0xc   :  { %701 = vmatpush3.bf16.msra.mxu0 %v811_v10  ;;  %v828_v32 = vld [vmem:[%s1079_s1 + $0xb0] sm:$0xff]   ;;  %v832_v37 = vld [vmem:[%s1079_s1 + $0xb8] sm:$0xff]   ;;  %v121_v42 = vrot.slane %v107_v39, %v113_v35  ;;  %v122_v44 = vcombine.high %v114_v40, %v114_v40  ;;  %v837_v49 = vld [vmem:[%s1081_s3 + $0x20] sm:$0xff]  }
   0xd   :  { %723 = vmatpush3.bf16.msra.mxu1 %v812_v11  ;;  %702 = vmatprep.subr.bf16.mxu0 %v813_v12  ;;  %v835_v47 = vld [vmem:[%s1081_s3 + $0x10] sm:$0xff]   ;;  %v836_v48 = vld [vmem:[%s1081_s3 + $0x18] sm:$0xff]   ;;  %v838_v50 = vld [vmem:[%s1081_s3 + $0x28] sm:$0xff]  }
   0xe   :  { %724 = vmatprep.subr.bf16.mxu1 %v814_v13  ;;  %352 = vmatprep.mubr.bf16.mxu0 %v121_v42  ;;  %v123_v45 = vcombine.high %v121_v42, %v121_v42  ;;  %v839_v51 = vld [vmem:[%s1081_s3 + $0x30] sm:$0xff]   ;;  %v840_v52 = vld [vmem:[%s1081_s3 + $0x38] sm:$0xff]   ;;  %v841_v53 = vld [vmem:[%s1082_s5] sm:$0xff]  }
   0xf   :  { %v842_v54 = vld [vmem:[%s1082_s5 + $0x8] sm:$0xff]   ;;  %v843_v55 = vld [vmem:[%s1082_s5 + $0x10] sm:$0xff]   ;;  %v844_v56 = vld [vmem:[%s1082_s5 + $0x18] sm:$0xff]  }
  0x10   :  { %703 = vmatpush3.bf16.msra.mxu0 %v815_v14  ;;  %392 = vmatprep.mubr.bf16.mxu1 %v123_v45  ;;  %v845_v57 = vld [vmem:[%s1082_s5 + $0x20] sm:$0xff]   ;;  %v846_v58 = vld [vmem:[%s1082_s5 + $0x28] sm:$0xff]   ;;  %v847_v10 = vld [vmem:[%s1082_s5 + $0x30] sm:$0xff]  }
  0x11   :  { %725 = vmatpush3.bf16.msra.mxu1 %v816_v15  ;;  %704 = vmatprep.subr.bf16.mxu0 %v817_v16  ;;  %v644_v60 = vld [vmem:[%s1083_s2] ss:$0 sm:$0xff]  ;;  %v848_v11 = vld [vmem:[%s1082_s5 + $0x38] sm:$0xff]  }
  0x12   :  { %726 = vmatprep.subr.bf16.mxu1 %v818_v17  ;;  %v678_v12 = vld [vmem:[%s1084_s4] ss:$0 sm:$0xff] }
  0x14   :  { %705 = vmatpush3.bf16.msra.mxu0 %v819_v18 }
  0x15   :  { %727 = vmatpush3.bf16.msra.mxu1 %v820_v19  ;;  %706 = vmatprep.subr.bf16.mxu0 %v821_v20  ;;  %v687_v20 = vld [vmem:[%s1085_s6] ss:$0 sm:$0xff] }
  0x16   :  { %728 = vmatprep.subr.bf16.mxu1 %v822_v21 }
  0x18   :  { %707 = vmatpush3.bf16.msra.mxu0 %v823_v25 }
  0x19   :  { %729 = vmatpush3.bf16.msra.mxu1 %v824_v26  ;;  %708 = vmatprep.subr.bf16.mxu0 %v825_v27 }
  0x1a   :  { %730 = vmatprep.subr.bf16.mxu1 %v826_v28 }
  0x1c   :  { %709 = vmatpush3.bf16.msra.mxu0 %v827_v31 }
  0x1d   :  { %731 = vmatpush3.bf16.msra.mxu1 %v828_v32  ;;  %710 = vmatprep.subr.bf16.mxu0 %v829_v33 }
  0x1e   :  { %732 = vmatprep.subr.bf16.mxu1 %v830_v34 }
  0x20   :  { %711 = vmatpush3.bf16.msra.mxu0 %v831_v36 }
  0x21   :  { %733 = vmatpush3.bf16.msra.mxu1 %v832_v37  ;;  %758 = vmatprep.subr.bf16.mxu0 %v854_v41 }
  0x22   :  { %778 = vmatprep.subr.bf16.mxu1 %v854_v41 }
  0x23   :  { %353 = vmatmul.mubr.bf16.vlgmr.msra.gmra.mrb[0].mxu0 %v114_v40 }
  0x24   :  { %759 = vmatpush3.bf16.msra.mxu0 %v833_v43  ;;  %393 = vmatmul.mubr.bf16.vlgmr.msra.gmra.mrb[0].mxu1 %v122_v44 }
  0x25   :  { %760 = vmatprep.subr.bf16.mxu0 %v854_v41  ;;  %774 = vmatprep.mubr.msk.bf16.mxu0 %vm855_vm0, %v854_v41 }
  0x26   :  { %794 = vmatprep.mubr.msk.bf16.mxu1 %vm855_vm0, %v854_v41  ;;  %779 = vmatpush3.bf16.msra.mxu1 %v841_v53 }
  0x27   :  { %780 = vmatprep.subr.bf16.mxu1 %v854_v41 }
  0x28   :  { %761 = vmatpush3.bf16.msra.mxu0 %v834_v46 }
  0x29   :  { %762 = vmatprep.subr.bf16.mxu0 %v854_v41 }
  0x2a   :  { %781 = vmatpush3.bf16.msra.mxu1 %v842_v54 }
  0x2b   :  { %782 = vmatprep.subr.bf16.mxu1 %v854_v41 }
  0x2c   :  { %763 = vmatpush3.bf16.msra.mxu0 %v835_v47 }
  0x2d   :  { %764 = vmatprep.subr.bf16.mxu0 %v854_v41 }
  0x2e   :  { %783 = vmatpush3.bf16.msra.mxu1 %v843_v55 }
  0x2f   :  { %784 = vmatprep.subr.bf16.mxu1 %v854_v41 }
  0x30   :  { %765 = vmatpush3.bf16.msra.mxu0 %v836_v48 }
  0x31   :  { %766 = vmatprep.subr.bf16.mxu0 %v854_v41 }
  0x32   :  { %785 = vmatpush3.bf16.msra.mxu1 %v844_v56 }
  0x33   :  { %786 = vmatprep.subr.bf16.mxu1 %v854_v41 }
  0x34   :  { %767 = vmatpush3.bf16.msra.mxu0 %v837_v49 }
  0x35   :  { %768 = vmatprep.subr.bf16.mxu0 %v854_v41 }
  0x36   :  { %787 = vmatpush3.bf16.msra.mxu1 %v845_v57 }
  0x37   :  { %788 = vmatprep.subr.bf16.mxu1 %v854_v41 }
  0x38   :  { %769 = vmatpush3.bf16.msra.mxu0 %v838_v50 }
  0x39   :  { %770 = vmatprep.subr.bf16.mxu0 %v854_v41 }
  0x3a   :  { %789 = vmatpush3.bf16.msra.mxu1 %v846_v58 }
  0x3b   :  { %790 = vmatprep.subr.bf16.mxu1 %v854_v41 }
  0x3c   :  { %771 = vmatpush3.bf16.msra.mxu0 %v839_v51 }
  0x3d   :  { %772 = vmatprep.subr.bf16.mxu0 %v854_v41 }
  0x3e   :  { %791 = vmatpush3.bf16.msra.mxu1 %v847_v10 }
  0x3f   :  { %792 = vmatprep.subr.bf16.mxu1 %v854_v41 }
  0x40   :  { %773 = vmatpush3.bf16.msra.mxu0 %v840_v52 }
  0x42   :  { %793 = vmatpush3.bf16.msra.mxu1 %v848_v11 }
  0xf6   :  { %v712_v59 = vpop.f32.mrb[0].mxu0 }
  0xf7   :  { %v713_v61 = vpop.f32.mrb[1].mxu0  ;;  %v734_v62 = vpop.f32.mrb[0].mxu1 }
  0xf8   :  { %v714_v63 = vadd.f32 %v713_v61, %v712_v59  ;;  %v715_v0 = vpop.f32.mrb[2].mxu0  ;;  %v735_v1 = vpop.f32.mrb[1].mxu1 }
  0xf9   :  { %v716_v2 = vpop.f32.mrb[3].mxu0  ;;  %v736_v4 = vadd.f32 %v735_v1, %v734_v62  ;;  %v737_v5 = vpop.f32.mrb[2].mxu1 }
  0xfa   :  { %v355_v3 = vadd.f32 %v714_v63, %v644_v60  ;;  %v738_v6 = vpop.f32.mrb[3].mxu1 }
  0xfc   :  { %v395_v7 = vadd.f32 %v736_v4, %v355_v3 }
  0xfe   :  { %v400_v8 = vmax.f32 %v395_v7, 0.0 }
 0x100   :  { %v401_v9 = vpack.c.bf16 %v400_v8, %v400_v8 }
 0x102   :  { %775 = vmatmul.mubr.bf16.vlgmr.msra.gmra.mrb[4].mxu0 %v401_v9 }
 0x1d5   :  { %v507_v13 = vpop.f32.mrb[4].mxu0 }
 0x1d6   :  { %v508_v14 = vadd.f32 %v678_v12, %v507_v13  ;;  %v776_v15 = vpop.f32.mrb[5].mxu0 }
 0x1d7   :  { %v510_v16 = vpop.f32.mrb[6].mxu0 }
 0x1d8   :  { %v513_v17 = vmax.f32 %v508_v14, 0.0  ;;  %v777_v18 = vpop.f32.mrb[7].mxu0 }
 0x1da   :  { %v514_v19 = vpack.c.bf16 %v513_v17, %v513_v17 }
 0x1dc   :  { %795 = vmatmul.mubr.bf16.vlgmr.msra.gmra.mrb[4].mxu1 %v514_v19 }
 0x2af   :  { %v620_v21 = vpop.f32.mrb[4].mxu1 }
 0x2b0   :  { %v621_v22 = vadd.f32 %v687_v20, %v620_v21  ;;  %v796_v23 = vpop.f32.mrb[5].mxu1 }
 0x2b1   :  { %v623_v24 = vpop.f32.mrb[6].mxu1 }
 0x2b2   :  { %638 = vst [vmem:[%s1086_s7] sm:$0x3] %v621_v22  ;;  %v797_v25 = vpop.f32.mrb[7].mxu1  ;;  %v627_v26 = vsel %vm626_vm1, %v621_v22, -inf }
 0x2b3   :  { %628 = vmax.xlane.f32.xlu0 %v627_v26 }
 0x340   :  { %v629_v27 = vpop.xlane.xlu0 %628 }
 0x341   :  { %v630_v28 = vsub.f32 %v621_v22, %v629_v27 }
 0x343   :  { %v631_v29 = vmul.f32 1.442695, %v630_v28 }
 0x345   :  { %849 = vpow2.f32 %v631_v29 }
 0x34f   :  { %v850_v30 = vpop.eup %849 }
 0x350   :  { %v633_v31 = vsel %vm626_vm1, %v850_v30, 0.0 }
 0x351   :  { %634 = vadd.xlane.f32.xlu0 %v633_v31 }
 0x3de   :  { %v635_v32 = vpop.xlane.xlu0 %634 }
 0x3df   :  { %851 = vrcp.f32 %v635_v32 }
 0x3e9   :  { %v852_v33 = vpop.eup %851 }
 0x3ea   :  { %v637_v34 = vmul.f32 %v852_v33, %v850_v30 }
 0x3ec   :  { %639 = vst.msk [vmem:[%s1086_s7] sm:$0x3] %vm626_vm1, %v637_v34 }

</bundles_post_ra>
